<compile_context>
chip_gen: v7x
topology: tpu7x:2x2x1
jax: 0.10.0
libtpu: 0.0.40
codegen_flags: <defaults>
</compile_context>

<pallas_src>
import numpy as np

import jax
import jax.numpy as jnp
from jax.experimental import pallas as pl
from jax.experimental.pallas import tpu as pltpu


# ---------------------------------------------------------------------------
# Static configuration
# ---------------------------------------------------------------------------

IN_H = IN_W = 32            # input_shape = (1, 32, 32)
IN_C = 1
CONV_FILTERS = (8, 16, 16)  # conv1/conv2/conv3 filters (scaled-down)
NUM_UNITS = 32
KSIZE, STRIDE, PAD = 5, 2, 2
POOL = 3                    # MaxPool2d(kernel_size=3, stride=1)


def _build_geoms():
    geoms = []
    h, w, ic = IN_H, IN_W, IN_C
    for oc in CONV_FILTERS:
        oh = (h + 2 * PAD - KSIZE) // STRIDE + 1
        ow = (w + 2 * PAD - KSIZE) // STRIDE + 1
        geoms.append(dict(H=h, W=w, IC=ic, OC=oc, OH=oh, OW=ow))
        h, w, ic = oh - (POOL - 1), ow - (POOL - 1), oc   # pool 3x3, stride 1
    return geoms, ic * h * w


GEOMS, N_SIZE = _build_geoms()      # N_SIZE == 16  (16 channels * 1 * 1)


# ---------------------------------------------------------------------------
# Fused kernel
# ---------------------------------------------------------------------------

def _conv_bn_relu_pool(act, sel_ref, m_ref, sc_ref, sh_ref, g):
    """One conv block on a single sample; activations in (H, W*C) layout.

    act:     (H, W*IC) f32
    sel_ref: (5*OH, H) constant 0/1 row-selection matrix (stride-2 gather +
             zero padding along H, for all 5 kernel rows at once)
    m_ref:   (5, W*IC, OW*OC) packed conv weights (kernel columns, channel
             mixing and zero padding along W folded in)
    sc_ref, sh_ref: (1, OW*OC) folded BatchNorm scale/shift tiled over OW
    returns: (OH-2, (OW-2)*OC) pooled activations for the next layer
    """
    OH, OW, OC = g["OH"], g["OW"], g["OC"]

    # stride-2 row gather for all 5 kernel rows: one MXU matmul.
    rows = jnp.dot(sel_ref[...], act, preferred_element_type=jnp.float32)

    # conv == 5 accumulating matmuls (one per kernel row).
    acc = jnp.dot(rows[0:OH, :], m_ref[0], preferred_element_type=jnp.float32)
    for di in range(1, KSIZE):
        acc = acc + jnp.dot(rows[di * OH:(di + 1) * OH, :], m_ref[di],
                            preferred_element_type=jnp.float32)

    # folded BatchNorm (eval mode) + ReLU.
    y = jnp.maximum(acc * sc_ref[...] + sh_ref[...], 0.0)       # (OH, OW*OC)

    # MaxPool2d(3, stride=1), separable: rows, then channel-packed columns.
    hm = jnp.maximum(jnp.maximum(y[0:OH - 2, :], y[1:OH - 1, :]), y[2:OH, :])
    pw = OW - 2
    wm = jnp.maximum(jnp.maximum(hm[:, 0:pw * OC],
                                 hm[:, OC:(pw + 1) * OC]),
                     hm[:, 2 * OC:(pw + 2) * OC])
    return wm


def _make_kernel(batch):
    def kernel(x_ref,
               sel1_ref, m1_ref, sc1_ref, sh1_ref,
               sel2_ref, m2_ref, sc2_ref, sh2_ref,
               sel3_ref, m3_ref, sc3_ref, sh3_ref,
               fc1w_ref, fc1b_ref, fc2w_ref, fc2b_ref,
               out_ref):
        conv_refs = ((sel1_ref, m1_ref, sc1_ref, sh1_ref),
                     (sel2_ref, m2_ref, sc2_ref, sh2_ref),
                     (sel3_ref, m3_ref, sc3_ref, sh3_ref))

        feats = []
        for n in range(batch):                      # static unroll (batch=2)
            act = x_ref[n]                          # (H, W*C0) = (32, 32)
            for g, (sel_ref, m_ref, sc_ref, sh_ref) in zip(GEOMS, conv_refs):
                act = _conv_bn_relu_pool(act, sel_ref, m_ref, sc_ref, sh_ref, g)
            feats.append(act)                       # (1, N_SIZE)

        # flatten: H = W = 1 after the last pool, so NCHW flatten == channels.
        feats = jnp.concatenate(feats, axis=0)      # (batch, N_SIZE)

        # fc_base: Dropout -> Linear -> ReLU -> Dropout -> Linear -> ReLU
        # TODO(synk): training-mode dropout (p=0.5) is not implemented;
        #             eval-mode identity semantics are used.
        h1 = jnp.maximum(
            jnp.dot(feats, fc1w_ref[...], preferred_element_type=jnp.float32)
            + fc1b_ref[...], 0.0)
        h2 = jnp.maximum(
            jnp.dot(h1, fc2w_ref[...], preferred_element_type=jnp.float32)
            + fc2b_ref[...], 0.0)
        out_ref[...] = h2

    return kernel


# ---------------------------------------------------------------------------
# pallas_call wrapper
# ---------------------------------------------------------------------------

def _spec(shape):
    nd = len(shape)
    return pl.BlockSpec(shape, lambda i, _nd=nd: (0,) * _nd)


def cnn_forward(x_nchw, prep):
    """x_nchw: (N, 1, IN_H, IN_W) f32 -> (N, NUM_UNITS)."""
    n = x_nchw.shape[0]
    x = x_nchw.astype(jnp.float32).reshape(n, IN_H, IN_W)   # (N, H, W*C), C=1

    operands = (
        x,
        prep["sel1"], prep["m1"], prep["scale1"], prep["shift1"],
        prep["sel2"], prep["m2"], prep["scale2"], prep["shift2"],
        prep["sel3"], prep["m3"], prep["scale3"], prep["shift3"],
        prep["fc1_w"], prep["fc1_b"], prep["fc2_w"], prep["fc2_b"],
    )

    # Single fused kernel: every intermediate activation stays in VMEM.
    # TODO(synk): when batch grows, add a "parallel" grid axis over batch rows
    #             so v7x megacore can split the work; at batch=2 one step wins.
    return pl.pallas_call(
        _make_kernel(n),
        out_shape=jax.ShapeDtypeStruct((n, NUM_UNITS), jnp.float32),
        grid=(1,),
        in_specs=[_spec(op.shape) for op in operands],
        out_specs=_spec((n, NUM_UNITS)),
        compiler_params=pltpu.CompilerParams(dimension_semantics=("arbitrary",)),
    )(*operands)


# ---------------------------------------------------------------------------
# Parameters: PyTorch-style init + one-time host-side packing
# ---------------------------------------------------------------------------

def _fold_bn(gamma, beta, mean, var, eps=1e-5):
    scale = gamma / jnp.sqrt(var + eps)
    shift = beta - mean * scale
    return scale, shift


def init_params(key):
    """PyTorch-layout parameters for the scaled-down CNN (eval mode)."""
    c1, c2, c3 = CONV_FILTERS
    ks = jax.random.split(key, 10)
    p = {}
    p["w1"] = 0.1 * jax.random.normal(ks[0], (c1, IN_C, KSIZE, KSIZE), jnp.float32)
    p["w2"] = 0.1 * jax.random.normal(ks[1], (c2, c1, KSIZE, KSIZE), jnp.float32)
    p["w3"] = 0.1 * jax.random.normal(ks[2], (c3, c2, KSIZE, KSIZE), jnp.float32)
    for idx, (kk, c) in enumerate(zip(ks[3:6], (c1, c2, c3)), start=1):
        k_g, k_b, k_m, k_v = jax.random.split(kk, 4)
        gamma = 0.5 + jax.random.uniform(k_g, (c,), jnp.float32)
        beta = 0.1 * jax.random.normal(k_b, (c,), jnp.float32)
        mean = 0.1 * jax.random.normal(k_m, (c,), jnp.float32)
        var = 0.5 + jax.random.uniform(k_v, (c,), jnp.float32)
        p[f"bn{idx}_scale"], p[f"bn{idx}_shift"] = _fold_bn(gamma, beta, mean, var)
    p["fc1_w"] = 0.1 * jax.random.normal(ks[6], (N_SIZE, NUM_UNITS), jnp.float32)
    p["fc1_b"] = 0.1 * jax.random.normal(ks[7], (NUM_UNITS,), jnp.float32)
    p["fc2_w"] = 0.1 * jax.random.normal(ks[8], (NUM_UNITS, NUM_UNITS), jnp.float32)
    p["fc2_b"] = 0.1 * jax.random.normal(ks[9], (NUM_UNITS,), jnp.float32)
    return p


def _pack_conv(wgt, g):
    """One-time host-side packing of a (OC, IC, 5, 5) conv weight.

    Returns
      sel: (5*OH, H)       sel[di*OH+oh, h] = 1  iff  h == 2*oh + di - 2
                           (stride-2 row gather, zero padding along H folded in)
      m:   (5, W*IC, OW*OC) m[di, w*IC+ic, ow*OC+oc] = wgt[oc, ic, di, dj]
                           where dj = w - 2*ow + 2 in [0, 5)
                           (kernel columns, channel mixing and W padding folded in)
    """
    H, W, IC, OC, OH, OW = g["H"], g["W"], g["IC"], g["OC"], g["OH"], g["OW"]

    sel = np.zeros((KSIZE, OH, H), np.float32)
    for di in range(KSIZE):
        for oh in range(OH):
            h = STRIDE * oh + di - PAD
            if 0 <= h < H:
                sel[di, oh, h] = 1.0
    sel = sel.reshape(KSIZE * OH, H)

    wnp = np.asarray(jax.device_get(wgt), np.float32)        # (OC, IC, 5, 5)
    m = np.zeros((KSIZE, W * IC, OW * OC), np.float32)
    for di in range(KSIZE):
        for dj in range(KSIZE):
            blk = wnp[:, :, di, dj].T                        # (IC, OC)
            for ow in range(OW):
                w_in = STRIDE * ow + dj - PAD
                if 0 <= w_in < W:
                    m[di, w_in * IC:(w_in + 1) * IC, ow * OC:(ow + 1) * OC] = blk
    return jnp.asarray(sel), jnp.asarray(m)


def prepare_params(p):
    """One-time weight preparation: weight-side im2col + BN scale/shift tiling."""
    prep = {}
    for l, (wk, g) in enumerate(zip(("w1", "w2", "w3"), GEOMS), start=1):
        sel, m = _pack_conv(p[wk], g)
        prep[f"sel{l}"] = sel
        prep[f"m{l}"] = m
        prep[f"scale{l}"] = jnp.tile(p[f"bn{l}_scale"], g["OW"]).reshape(1, -1)
        prep[f"shift{l}"] = jnp.tile(p[f"bn{l}_shift"], g["OW"]).reshape(1, -1)
    prep["fc1_w"] = p["fc1_w"]
    prep["fc1_b"] = p["fc1_b"].reshape(1, NUM_UNITS)
    prep["fc2_w"] = p["fc2_w"]
    prep["fc2_b"] = p["fc2_b"].reshape(1, NUM_UNITS)
    return prep


if __name__ == "__main__":
    key = jax.random.PRNGKey(0)
    k_param, k_x = jax.random.split(key)

    params = init_params(k_param)
    prep = prepare_params(params)                 # host-side, once
    x = jax.random.normal(k_x, (2, IN_C, IN_H, IN_W), dtype=jnp.float32)  # NCHW

    out = jax.jit(cnn_forward)(x, prep)
    out = jax.block_until_ready(out)
    assert out.shape == (2, NUM_UNITS), out.shape
    print("KERNEL_OK")
</pallas_src>

<mosaic_0001>
module attributes {stable_mosaic.version = 11 : i64} {
  func.func @kernel(%arg0: i32, %arg1: memref<2x32x32xf32, #tpu.memory_space<vmem>>, %arg2: memref<80x32xf32, #tpu.memory_space<vmem>>, %arg3: memref<5x32x128xf32, #tpu.memory_space<vmem>>, %arg4: memref<1x128xf32, #tpu.memory_space<vmem>>, %arg5: memref<1x128xf32, #tpu.memory_space<vmem>>, %arg6: memref<35x14xf32, #tpu.memory_space<vmem>>, %arg7: memref<5x112x112xf32, #tpu.memory_space<vmem>>, %arg8: memref<1x112xf32, #tpu.memory_space<vmem>>, %arg9: memref<1x112xf32, #tpu.memory_space<vmem>>, %arg10: memref<15x5xf32, #tpu.memory_space<vmem>>, %arg11: memref<5x80x48xf32, #tpu.memory_space<vmem>>, %arg12: memref<1x48xf32, #tpu.memory_space<vmem>>, %arg13: memref<1x48xf32, #tpu.memory_space<vmem>>, %arg14: memref<16x32xf32, #tpu.memory_space<vmem>>, %arg15: memref<1x32xf32, #tpu.memory_space<vmem>>, %arg16: memref<32x32xf32, #tpu.memory_space<vmem>>, %arg17: memref<1x32xf32, #tpu.memory_space<vmem>>, %arg18: memref<2x32xf32, #tpu.memory_space<vmem>>) attributes {dimension_semantics = [#tpu.dimension_semantics<arbitrary>], iteration_bounds = array<i64: 1>, scalar_prefetch = 0 : i64, scratch_operands = 0 : i64, tpu.core_type = #tpu.core_type<tc>, window_params = [{pipeline_mode = #tpu.pipeline_mode<synchronous>, transform_indices = @transform_0, window_bounds = array<i64: 2, 32, 32>}, {pipeline_mode = #tpu.pipeline_mode<synchronous>, transform_indices = @transform_1, window_bounds = array<i64: 80, 32>}, {pipeline_mode = #tpu.pipeline_mode<synchronous>, transform_indices = @transform_2, window_bounds = array<i64: 5, 32, 128>}, {pipeline_mode = #tpu.pipeline_mode<synchronous>, transform_indices = @transform_3, window_bounds = array<i64: 1, 128>}, {pipeline_mode = #tpu.pipeline_mode<synchronous>, transform_indices = @transform_4, window_bounds = array<i64: 1, 128>}, {pipeline_mode = #tpu.pipeline_mode<synchronous>, transform_indices = @transform_5, window_bounds = array<i64: 35, 14>}, {pipeline_mode = #tpu.pipeline_mode<synchronous>, transform_indices = @transform_6, window_bounds = array<i64: 5, 112, 112>}, {pipeline_mode = #tpu.pipeline_mode<synchronous>, transform_indices = @transform_7, window_bounds = array<i64: 1, 112>}, {pipeline_mode = #tpu.pipeline_mode<synchronous>, transform_indices = @transform_8, window_bounds = array<i64: 1, 112>}, {pipeline_mode = #tpu.pipeline_mode<synchronous>, transform_indices = @transform_9, window_bounds = array<i64: 15, 5>}, {pipeline_mode = #tpu.pipeline_mode<synchronous>, transform_indices = @transform_10, window_bounds = array<i64: 5, 80, 48>}, {pipeline_mode = #tpu.pipeline_mode<synchronous>, transform_indices = @transform_11, window_bounds = array<i64: 1, 48>}, {pipeline_mode = #tpu.pipeline_mode<synchronous>, transform_indices = @transform_12, window_bounds = array<i64: 1, 48>}, {pipeline_mode = #tpu.pipeline_mode<synchronous>, transform_indices = @transform_13, window_bounds = array<i64: 16, 32>}, {pipeline_mode = #tpu.pipeline_mode<synchronous>, transform_indices = @transform_14, window_bounds = array<i64: 1, 32>}, {pipeline_mode = #tpu.pipeline_mode<synchronous>, transform_indices = @transform_15, window_bounds = array<i64: 32, 32>}, {pipeline_mode = #tpu.pipeline_mode<synchronous>, transform_indices = @transform_16, window_bounds = array<i64: 1, 32>}, {pipeline_mode = #tpu.pipeline_mode<synchronous>, transform_indices = @transform_17, window_bounds = array<i64: 2, 32>}]} {
    %c0 = arith.constant 0 : index
    %c0_0 = arith.constant 0 : index
    %c0_1 = arith.constant 0 : index
    %0 = vector.load %arg1[%c0, %c0_0, %c0_1] : memref<2x32x32xf32, #tpu.memory_space<vmem>>, vector<1x32x32xf32>
    %1 = vector.shape_cast %0 : vector<1x32x32xf32> to vector<32x32xf32>
    %c0_2 = arith.constant 0 : index
    %c0_3 = arith.constant 0 : index
    %2 = vector.load %arg2[%c0_2, %c0_3] : memref<80x32xf32, #tpu.memory_space<vmem>>, vector<80x32xf32>
    %cst = arith.constant dense<0.000000e+00> : vector<80x32xf32>
    %3 = tpu.matmul %2, %1, %cst {dimension_numbers = #tpu.dot_dimension_numbers<[1], [0], [0], [1], [0, 0, 1, 1], [], []>} : vector<80x32xf32>, vector<32x32xf32>, vector<80x32xf32> -> vector<80x32xf32>
    %4 = vector.extract_strided_slice %3 {offsets = [0, 0], sizes = [16, 32], strides = [1, 1]} : vector<80x32xf32> to vector<16x32xf32>
    %c0_4 = arith.constant 0 : index
    %c0_5 = arith.constant 0 : index
    %c0_6 = arith.constant 0 : index
    %5 = vector.load %arg3[%c0_4, %c0_5, %c0_6] : memref<5x32x128xf32, #tpu.memory_space<vmem>>, vector<1x32x128xf32>
    %6 = vector.shape_cast %5 : vector<1x32x128xf32> to vector<32x128xf32>
    %cst_7 = arith.constant dense<0.000000e+00> : vector<16x128xf32>
    %7 = tpu.matmul %4, %6, %cst_7 {dimension_numbers = #tpu.dot_dimension_numbers<[1], [0], [0], [1], [0, 0, 1, 1], [], []>} : vector<16x32xf32>, vector<32x128xf32>, vector<16x128xf32> -> vector<16x128xf32>
    %8 = vector.extract_strided_slice %3 {offsets = [16, 0], sizes = [16, 32], strides = [1, 1]} : vector<80x32xf32> to vector<16x32xf32>
    %c1 = arith.constant 1 : index
    %c0_8 = arith.constant 0 : index
    %c0_9 = arith.constant 0 : index
    %9 = vector.load %arg3[%c1, %c0_8, %c0_9] : memref<5x32x128xf32, #tpu.memory_space<vmem>>, vector<1x32x128xf32>
    %10 = vector.shape_cast %9 : vector<1x32x128xf32> to vector<32x128xf32>
    %cst_10 = arith.constant dense<0.000000e+00> : vector<16x128xf32>
    %11 = tpu.matmul %8, %10, %cst_10 {dimension_numbers = #tpu.dot_dimension_numbers<[1], [0], [0], [1], [0, 0, 1, 1], [], []>} : vector<16x32xf32>, vector<32x128xf32>, vector<16x128xf32> -> vector<16x128xf32>
    %12 = arith.addf %7, %11 : vector<16x128xf32>
    %13 = vector.extract_strided_slice %3 {offsets = [32, 0], sizes = [16, 32], strides = [1, 1]} : vector<80x32xf32> to vector<16x32xf32>
    %c2 = arith.constant 2 : index
    %c0_11 = arith.constant 0 : index
    %c0_12 = arith.constant 0 : index
    %14 = vector.load %arg3[%c2, %c0_11, %c0_12] : memref<5x32x128xf32, #tpu.memory_space<vmem>>, vector<1x32x128xf32>
    %15 = vector.shape_cast %14 : vector<1x32x128xf32> to vector<32x128xf32>
    %cst_13 = arith.constant dense<0.000000e+00> : vector<16x128xf32>
    %16 = tpu.matmul %13, %15, %cst_13 {dimension_numbers = #tpu.dot_dimension_numbers<[1], [0], [0], [1], [0, 0, 1, 1], [], []>} : vector<16x32xf32>, vector<32x128xf32>, vector<16x128xf32> -> vector<16x128xf32>
    %17 = arith.addf %12, %16 : vector<16x128xf32>
    %18 = vector.extract_strided_slice %3 {offsets = [48, 0], sizes = [16, 32], strides = [1, 1]} : vector<80x32xf32> to vector<16x32xf32>
    %c3 = arith.constant 3 : index
    %c0_14 = arith.constant 0 : index
    %c0_15 = arith.constant 0 : index
    %19 = vector.load %arg3[%c3, %c0_14, %c0_15] : memref<5x32x128xf32, #tpu.memory_space<vmem>>, vector<1x32x128xf32>
    %20 = vector.shape_cast %19 : vector<1x32x128xf32> to vector<32x128xf32>
    %cst_16 = arith.constant dense<0.000000e+00> : vector<16x128xf32>
    %21 = tpu.matmul %18, %20, %cst_16 {dimension_numbers = #tpu.dot_dimension_numbers<[1], [0], [0], [1], [0, 0, 1, 1], [], []>} : vector<16x32xf32>, vector<32x128xf32>, vector<16x128xf32> -> vector<16x128xf32>
    %22 = arith.addf %17, %21 : vector<16x128xf32>
    %23 = vector.extract_strided_slice %3 {offsets = [64, 0], sizes = [16, 32], strides = [1, 1]} : vector<80x32xf32> to vector<16x32xf32>
    %c4 = arith.constant 4 : index
    %c0_17 = arith.constant 0 : index
    %c0_18 = arith.constant 0 : index
    %24 = vector.load %arg3[%c4, %c0_17, %c0_18] : memref<5x32x128xf32, #tpu.memory_space<vmem>>, vector<1x32x128xf32>
    %25 = vector.shape_cast %24 : vector<1x32x128xf32> to vector<32x128xf32>
    %cst_19 = arith.constant dense<0.000000e+00> : vector<16x128xf32>
    %26 = tpu.matmul %23, %25, %cst_19 {dimension_numbers = #tpu.dot_dimension_numbers<[1], [0], [0], [1], [0, 0, 1, 1], [], []>} : vector<16x32xf32>, vector<32x128xf32>, vector<16x128xf32> -> vector<16x128xf32>
    %27 = arith.addf %22, %26 : vector<16x128xf32>
    %c0_20 = arith.constant 0 : index
    %c0_21 = arith.constant 0 : index
    %28 = vector.load %arg4[%c0_20, %c0_21] : memref<1x128xf32, #tpu.memory_space<vmem>>, vector<1x128xf32>
    %29 = vector.broadcast %28 : vector<1x128xf32> to vector<16x128xf32>
    %30 = arith.mulf %27, %29 : vector<16x128xf32>
    %c0_22 = arith.constant 0 : index
    %c0_23 = arith.constant 0 : index
    %31 = vector.load %arg5[%c0_22, %c0_23] : memref<1x128xf32, #tpu.memory_space<vmem>>, vector<1x128xf32>
    %32 = vector.broadcast %31 : vector<1x128xf32> to vector<16x128xf32>
    %33 = arith.addf %30, %32 : vector<16x128xf32>
    %cst_24 = arith.constant 0.000000e+00 : f32
    %34 = vector.broadcast %cst_24 : f32 to vector<16x128xf32>
    %35 = arith.maximumf %33, %34 : vector<16x128xf32>
    %36 = vector.extract_strided_slice %35 {offsets = [0, 0], sizes = [14, 128], strides = [1, 1]} : vector<16x128xf32> to vector<14x128xf32>
    %37 = vector.extract_strided_slice %35 {offsets = [1, 0], sizes = [14, 128], strides = [1, 1]} : vector<16x128xf32> to vector<14x128xf32>
    %38 = arith.maximumf %36, %37 : vector<14x128xf32>
    %39 = vector.extract_strided_slice %35 {offsets = [2, 0], sizes = [14, 128], strides = [1, 1]} : vector<16x128xf32> to vector<14x128xf32>
    %40 = arith.maximumf %38, %39 : vector<14x128xf32>
    %41 = vector.extract_strided_slice %40 {offsets = [0, 0], sizes = [14, 112], strides = [1, 1]} : vector<14x128xf32> to vector<14x112xf32>
    %42 = vector.extract_strided_slice %40 {offsets = [0, 8], sizes = [14, 112], strides = [1, 1]} : vector<14x128xf32> to vector<14x112xf32>
    %43 = arith.maximumf %41, %42 : vector<14x112xf32>
    %44 = vector.extract_strided_slice %40 {offsets = [0, 16], sizes = [14, 112], strides = [1, 1]} : vector<14x128xf32> to vector<14x112xf32>
    %45 = arith.maximumf %43, %44 : vector<14x112xf32>
    %c0_25 = arith.constant 0 : index
    %c0_26 = arith.constant 0 : index
    %46 = vector.load %arg6[%c0_25, %c0_26] : memref<35x14xf32, #tpu.memory_space<vmem>>, vector<35x14xf32>
    %cst_27 = arith.constant dense<0.000000e+00> : vector<35x112xf32>
    %47 = tpu.matmul %46, %45, %cst_27 {dimension_numbers = #tpu.dot_dimension_numbers<[1], [0], [0], [1], [0, 0, 1, 1], [], []>} : vector<35x14xf32>, vector<14x112xf32>, vector<35x112xf32> -> vector<35x112xf32>
    %48 = vector.extract_strided_slice %47 {offsets = [0, 0], sizes = [7, 112], strides = [1, 1]} : vector<35x112xf32> to vector<7x112xf32>
    %c0_28 = arith.constant 0 : index
    %c0_29 = arith.constant 0 : index
    %c0_30 = arith.constant 0 : index
    %49 = vector.load %arg7[%c0_28, %c0_29, %c0_30] : memref<5x112x112xf32, #tpu.memory_space<vmem>>, vector<1x112x112xf32>
    %50 = vector.shape_cast %49 : vector<1x112x112xf32> to vector<112x112xf32>
    %cst_31 = arith.constant dense<0.000000e+00> : vector<7x112xf32>
    %51 = tpu.matmul %48, %50, %cst_31 {dimension_numbers = #tpu.dot_dimension_numbers<[1], [0], [0], [1], [0, 0, 1, 1], [], []>} : vector<7x112xf32>, vector<112x112xf32>, vector<7x112xf32> -> vector<7x112xf32>
    %52 = vector.extract_strided_slice %47 {offsets = [7, 0], sizes = [7, 112], strides = [1, 1]} : vector<35x112xf32> to vector<7x112xf32>
    %c1_32 = arith.constant 1 : index
    %c0_33 = arith.constant 0 : index
    %c0_34 = arith.constant 0 : index
    %53 = vector.load %arg7[%c1_32, %c0_33, %c0_34] : memref<5x112x112xf32, #tpu.memory_space<vmem>>, vector<1x112x112xf32>
    %54 = vector.shape_cast %53 : vector<1x112x112xf32> to vector<112x112xf32>
    %cst_35 = arith.constant dense<0.000000e+00> : vector<7x112xf32>
    %55 = tpu.matmul %52, %54, %cst_35 {dimension_numbers = #tpu.dot_dimension_numbers<[1], [0], [0], [1], [0, 0, 1, 1], [], []>} : vector<7x112xf32>, vector<112x112xf32>, vector<7x112xf32> -> vector<7x112xf32>
    %56 = arith.addf %51, %55 : vector<7x112xf32>
    %57 = vector.extract_strided_slice %47 {offsets = [14, 0], sizes = [7, 112], strides = [1, 1]} : vector<35x112xf32> to vector<7x112xf32>
    %c2_36 = arith.constant 2 : index
    %c0_37 = arith.constant 0 : index
    %c0_38 = arith.constant 0 : index
    %58 = vector.load %arg7[%c2_36, %c0_37, %c0_38] : memref<5x112x112xf32, #tpu.memory_space<vmem>>, vector<1x112x112xf32>
    %59 = vector.shape_cast %58 : vector<1x112x112xf32> to vector<112x112xf32>
    %cst_39 = arith.constant dense<0.000000e+00> : vector<7x112xf32>
    %60 = tpu.matmul %57, %59, %cst_39 {dimension_numbers = #tpu.dot_dimension_numbers<[1], [0], [0], [1], [0, 0, 1, 1], [], []>} : vector<7x112xf32>, vector<112x112xf32>, vector<7x112xf32> -> vector<7x112xf32>
    %61 = arith.addf %56, %60 : vector<7x112xf32>
    %62 = vector.extract_strided_slice %47 {offsets = [21, 0], sizes = [7, 112], strides = [1, 1]} : vector<35x112xf32> to vector<7x112xf32>
    %c3_40 = arith.constant 3 : index
    %c0_41 = arith.constant 0 : index
    %c0_42 = arith.constant 0 : index
    %63 = vector.load %arg7[%c3_40, %c0_41, %c0_42] : memref<5x112x112xf32, #tpu.memory_space<vmem>>, vector<1x112x112xf32>
    %64 = vector.shape_cast %63 : vector<1x112x112xf32> to vector<112x112xf32>
    %cst_43 = arith.constant dense<0.000000e+00> : vector<7x112xf32>
    %65 = tpu.matmul %62, %64, %cst_43 {dimension_numbers = #tpu.dot_dimension_numbers<[1], [0], [0], [1], [0, 0, 1, 1], [], []>} : vector<7x112xf32>, vector<112x112xf32>, vector<7x112xf32> -> vector<7x112xf32>
    %66 = arith.addf %61, %65 : vector<7x112xf32>
    %67 = vector.extract_strided_slice %47 {offsets = [28, 0], sizes = [7, 112], strides = [1, 1]} : vector<35x112xf32> to vector<7x112xf32>
    %c4_44 = arith.constant 4 : index
    %c0_45 = arith.constant 0 : index
    %c0_46 = arith.constant 0 : index
    %68 = vector.load %arg7[%c4_44, %c0_45, %c0_46] : memref<5x112x112xf32, #tpu.memory_space<vmem>>, vector<1x112x112xf32>
    %69 = vector.shape_cast %68 : vector<1x112x112xf32> to vector<112x112xf32>
    %cst_47 = arith.constant dense<0.000000e+00> : vector<7x112xf32>
    %70 = tpu.matmul %67, %69, %cst_47 {dimension_numbers = #tpu.dot_dimension_numbers<[1], [0], [0], [1], [0, 0, 1, 1], [], []>} : vector<7x112xf32>, vector<112x112xf32>, vector<7x112xf32> -> vector<7x112xf32>
    %71 = arith.addf %66, %70 : vector<7x112xf32>
    %c0_48 = arith.constant 0 : index
    %c0_49 = arith.constant 0 : index
    %72 = vector.load %arg8[%c0_48, %c0_49] : memref<1x112xf32, #tpu.memory_space<vmem>>, vector<1x112xf32>
    %73 = vector.broadcast %72 : vector<1x112xf32> to vector<7x112xf32>
    %74 = arith.mulf %71, %73 : vector<7x112xf32>
    %c0_50 = arith.constant 0 : index
    %c0_51 = arith.constant 0 : index
    %75 = vector.load %arg9[%c0_50, %c0_51] : memref<1x112xf32, #tpu.memory_space<vmem>>, vector<1x112xf32>
    %76 = vector.broadcast %75 : vector<1x112xf32> to vector<7x112xf32>
    %77 = arith.addf %74, %76 : vector<7x112xf32>
    %cst_52 = arith.constant 0.000000e+00 : f32
    %78 = vector.broadcast %cst_52 : f32 to vector<7x112xf32>
    %79 = arith.maximumf %77, %78 : vector<7x112xf32>
    %80 = vector.extract_strided_slice %79 {offsets = [0, 0], sizes = [5, 112], strides = [1, 1]} : vector<7x112xf32> to vector<5x112xf32>
    %81 = vector.extract_strided_slice %79 {offsets = [1, 0], sizes = [5, 112], strides = [1, 1]} : vector<7x112xf32> to vector<5x112xf32>
    %82 = arith.maximumf %80, %81 : vector<5x112xf32>
    %83 = vector.extract_strided_slice %79 {offsets = [2, 0], sizes = [5, 112], strides = [1, 1]} : vector<7x112xf32> to vector<5x112xf32>
    %84 = arith.maximumf %82, %83 : vector<5x112xf32>
    %85 = vector.extract_strided_slice %84 {offsets = [0, 0], sizes = [5, 80], strides = [1, 1]} : vector<5x112xf32> to vector<5x80xf32>
    %86 = vector.extract_strided_slice %84 {offsets = [0, 16], sizes = [5, 80], strides = [1, 1]} : vector<5x112xf32> to vector<5x80xf32>
    %87 = arith.maximumf %85, %86 : vector<5x80xf32>
    %88 = vector.extract_strided_slice %84 {offsets = [0, 32], sizes = [5, 80], strides = [1, 1]} : vector<5x112xf32> to vector<5x80xf32>
    %89 = arith.maximumf %87, %88 : vector<5x80xf32>
    %c0_53 = arith.constant 0 : index
    %c0_54 = arith.constant 0 : index
    %90 = vector.load %arg10[%c0_53, %c0_54] : memref<15x5xf32, #tpu.memory_space<vmem>>, vector<15x5xf32>
    %cst_55 = arith.constant dense<0.000000e+00> : vector<15x80xf32>
    %91 = tpu.matmul %90, %89, %cst_55 {dimension_numbers = #tpu.dot_dimension_numbers<[1], [0], [0], [1], [0, 0, 1, 1], [], []>} : vector<15x5xf32>, vector<5x80xf32>, vector<15x80xf32> -> vector<15x80xf32>
    %92 = vector.extract_strided_slice %91 {offsets = [0, 0], sizes = [3, 80], strides = [1, 1]} : vector<15x80xf32> to vector<3x80xf32>
    %c0_56 = arith.constant 0 : index
    %c0_57 = arith.constant 0 : index
    %c0_58 = arith.constant 0 : index
    %93 = vector.load %arg11[%c0_56, %c0_57, %c0_58] : memref<5x80x48xf32, #tpu.memory_space<vmem>>, vector<1x80x48xf32>
    %94 = vector.shape_cast %93 : vector<1x80x48xf32> to vector<80x48xf32>
    %cst_59 = arith.constant dense<0.000000e+00> : vector<3x48xf32>
    %95 = tpu.matmul %92, %94, %cst_59 {dimension_numbers = #tpu.dot_dimension_numbers<[1], [0], [0], [1], [0, 0, 1, 1], [], []>} : vector<3x80xf32>, vector<80x48xf32>, vector<3x48xf32> -> vector<3x48xf32>
    %96 = vector.extract_strided_slice %91 {offsets = [3, 0], sizes = [3, 80], strides = [1, 1]} : vector<15x80xf32> to vector<3x80xf32>
    %c1_60 = arith.constant 1 : index
    %c0_61 = arith.constant 0 : index
    %c0_62 = arith.constant 0 : index
    %97 = vector.load %arg11[%c1_60, %c0_61, %c0_62] : memref<5x80x48xf32, #tpu.memory_space<vmem>>, vector<1x80x48xf32>
    %98 = vector.shape_cast %97 : vector<1x80x48xf32> to vector<80x48xf32>
    %cst_63 = arith.constant dense<0.000000e+00> : vector<3x48xf32>
    %99 = tpu.matmul %96, %98, %cst_63 {dimension_numbers = #tpu.dot_dimension_numbers<[1], [0], [0], [1], [0, 0, 1, 1], [], []>} : vector<3x80xf32>, vector<80x48xf32>, vector<3x48xf32> -> vector<3x48xf32>
    %100 = arith.addf %95, %99 : vector<3x48xf32>
    %101 = vector.extract_strided_slice %91 {offsets = [6, 0], sizes = [3, 80], strides = [1, 1]} : vector<15x80xf32> to vector<3x80xf32>
    %c2_64 = arith.constant 2 : index
    %c0_65 = arith.constant 0 : index
    %c0_66 = arith.constant 0 : index
    %102 = vector.load %arg11[%c2_64, %c0_65, %c0_66] : memref<5x80x48xf32, #tpu.memory_space<vmem>>, vector<1x80x48xf32>
    %103 = vector.shape_cast %102 : vector<1x80x48xf32> to vector<80x48xf32>
    %cst_67 = arith.constant dense<0.000000e+00> : vector<3x48xf32>
    %104 = tpu.matmul %101, %103, %cst_67 {dimension_numbers = #tpu.dot_dimension_numbers<[1], [0], [0], [1], [0, 0, 1, 1], [], []>} : vector<3x80xf32>, vector<80x48xf32>, vector<3x48xf32> -> vector<3x48xf32>
    %105 = arith.addf %100, %104 : vector<3x48xf32>
    %106 = vector.extract_strided_slice %91 {offsets = [9, 0], sizes = [3, 80], strides = [1, 1]} : vector<15x80xf32> to vector<3x80xf32>
    %c3_68 = arith.constant 3 : index
    %c0_69 = arith.constant 0 : index
    %c0_70 = arith.constant 0 : index
    %107 = vector.load %arg11[%c3_68, %c0_69, %c0_70] : memref<5x80x48xf32, #tpu.memory_space<vmem>>, vector<1x80x48xf32>
    %108 = vector.shape_cast %107 : vector<1x80x48xf32> to vector<80x48xf32>
    %cst_71 = arith.constant dense<0.000000e+00> : vector<3x48xf32>
    %109 = tpu.matmul %106, %108, %cst_71 {dimension_numbers = #tpu.dot_dimension_numbers<[1], [0], [0], [1], [0, 0, 1, 1], [], []>} : vector<3x80xf32>, vector<80x48xf32>, vector<3x48xf32> -> vector<3x48xf32>
    %110 = arith.addf %105, %109 : vector<3x48xf32>
    %111 = vector.extract_strided_slice %91 {offsets = [12, 0], sizes = [3, 80], strides = [1, 1]} : vector<15x80xf32> to vector<3x80xf32>
    %c4_72 = arith.constant 4 : index
    %c0_73 = arith.constant 0 : index
    %c0_74 = arith.constant 0 : index
    %112 = vector.load %arg11[%c4_72, %c0_73, %c0_74] : memref<5x80x48xf32, #tpu.memory_space<vmem>>, vector<1x80x48xf32>
    %113 = vector.shape_cast %112 : vector<1x80x48xf32> to vector<80x48xf32>
    %cst_75 = arith.constant dense<0.000000e+00> : vector<3x48xf32>
    %114 = tpu.matmul %111, %113, %cst_75 {dimension_numbers = #tpu.dot_dimension_numbers<[1], [0], [0], [1], [0, 0, 1, 1], [], []>} : vector<3x80xf32>, vector<80x48xf32>, vector<3x48xf32> -> vector<3x48xf32>
    %115 = arith.addf %110, %114 : vector<3x48xf32>
    %c0_76 = arith.constant 0 : index
    %c0_77 = arith.constant 0 : index
    %116 = vector.load %arg12[%c0_76, %c0_77] : memref<1x48xf32, #tpu.memory_space<vmem>>, vector<1x48xf32>
    %117 = vector.broadcast %116 : vector<1x48xf32> to vector<3x48xf32>
    %118 = arith.mulf %115, %117 : vector<3x48xf32>
    %c0_78 = arith.constant 0 : index
    %c0_79 = arith.constant 0 : index
    %119 = vector.load %arg13[%c0_78, %c0_79] : memref<1x48xf32, #tpu.memory_space<vmem>>, vector<1x48xf32>
    %120 = vector.broadcast %119 : vector<1x48xf32> to vector<3x48xf32>
    %121 = arith.addf %118, %120 : vector<3x48xf32>
    %cst_80 = arith.constant 0.000000e+00 : f32
    %122 = vector.broadcast %cst_80 : f32 to vector<3x48xf32>
    %123 = arith.maximumf %121, %122 : vector<3x48xf32>
    %124 = vector.extract_strided_slice %123 {offsets = [0, 0], sizes = [1, 48], strides = [1, 1]} : vector<3x48xf32> to vector<1x48xf32>
    %125 = vector.extract_strided_slice %123 {offsets = [1, 0], sizes = [1, 48], strides = [1, 1]} : vector<3x48xf32> to vector<1x48xf32>
    %126 = arith.maximumf %124, %125 : vector<1x48xf32>
    %127 = vector.extract_strided_slice %123 {offsets = [2, 0], sizes = [1, 48], strides = [1, 1]} : vector<3x48xf32> to vector<1x48xf32>
    %128 = arith.maximumf %126, %127 : vector<1x48xf32>
    %129 = vector.extract_strided_slice %128 {offsets = [0, 0], sizes = [1, 16], strides = [1, 1]} : vector<1x48xf32> to vector<1x16xf32>
    %130 = vector.extract_strided_slice %128 {offsets = [0, 16], sizes = [1, 16], strides = [1, 1]} : vector<1x48xf32> to vector<1x16xf32>
    %131 = arith.maximumf %129, %130 : vector<1x16xf32>
    %132 = vector.extract_strided_slice %128 {offsets = [0, 32], sizes = [1, 16], strides = [1, 1]} : vector<1x48xf32> to vector<1x16xf32>
    %133 = arith.maximumf %131, %132 : vector<1x16xf32>
    %c1_81 = arith.constant 1 : index
    %c0_82 = arith.constant 0 : index
    %c0_83 = arith.constant 0 : index
    %134 = vector.load %arg1[%c1_81, %c0_82, %c0_83] : memref<2x32x32xf32, #tpu.memory_space<vmem>>, vector<1x32x32xf32>
    %135 = vector.shape_cast %134 : vector<1x32x32xf32> to vector<32x32xf32>
    %c0_84 = arith.constant 0 : index
    %c0_85 = arith.constant 0 : index
    %136 = vector.load %arg2[%c0_84, %c0_85] : memref<80x32xf32, #tpu.memory_space<vmem>>, vector<80x32xf32>
    %cst_86 = arith.constant dense<0.000000e+00> : vector<80x32xf32>
    %137 = tpu.matmul %136, %135, %cst_86 {dimension_numbers = #tpu.dot_dimension_numbers<[1], [0], [0], [1], [0, 0, 1, 1], [], []>} : vector<80x32xf32>, vector<32x32xf32>, vector<80x32xf32> -> vector<80x32xf32>
    %138 = vector.extract_strided_slice %137 {offsets = [0, 0], sizes = [16, 32], strides = [1, 1]} : vector<80x32xf32> to vector<16x32xf32>
    %c0_87 = arith.constant 0 : index
    %c0_88 = arith.constant 0 : index
    %c0_89 = arith.constant 0 : index
    %139 = vector.load %arg3[%c0_87, %c0_88, %c0_89] : memref<5x32x128xf32, #tpu.memory_space<vmem>>, vector<1x32x128xf32>
    %140 = vector.shape_cast %139 : vector<1x32x128xf32> to vector<32x128xf32>
    %cst_90 = arith.constant dense<0.000000e+00> : vector<16x128xf32>
    %141 = tpu.matmul %138, %140, %cst_90 {dimension_numbers = #tpu.dot_dimension_numbers<[1], [0], [0], [1], [0, 0, 1, 1], [], []>} : vector<16x32xf32>, vector<32x128xf32>, vector<16x128xf32> -> vector<16x128xf32>
    %142 = vector.extract_strided_slice %137 {offsets = [16, 0], sizes = [16, 32], strides = [1, 1]} : vector<80x32xf32> to vector<16x32xf32>
    %c1_91 = arith.constant 1 : index
    %c0_92 = arith.constant 0 : index
    %c0_93 = arith.constant 0 : index
    %143 = vector.load %arg3[%c1_91, %c0_92, %c0_93] : memref<5x32x128xf32, #tpu.memory_space<vmem>>, vector<1x32x128xf32>
    %144 = vector.shape_cast %143 : vector<1x32x128xf32> to vector<32x128xf32>
    %cst_94 = arith.constant dense<0.000000e+00> : vector<16x128xf32>
    %145 = tpu.matmul %142, %144, %cst_94 {dimension_numbers = #tpu.dot_dimension_numbers<[1], [0], [0], [1], [0, 0, 1, 1], [], []>} : vector<16x32xf32>, vector<32x128xf32>, vector<16x128xf32> -> vector<16x128xf32>
    %146 = arith.addf %141, %145 : vector<16x128xf32>
    %147 = vector.extract_strided_slice %137 {offsets = [32, 0], sizes = [16, 32], strides = [1, 1]} : vector<80x32xf32> to vector<16x32xf32>
    %c2_95 = arith.constant 2 : index
    %c0_96 = arith.constant 0 : index
    %c0_97 = arith.constant 0 : index
    %148 = vector.load %arg3[%c2_95, %c0_96, %c0_97] : memref<5x32x128xf32, #tpu.memory_space<vmem>>, vector<1x32x128xf32>
    %149 = vector.shape_cast %148 : vector<1x32x128xf32> to vector<32x128xf32>
    %cst_98 = arith.constant dense<0.000000e+00> : vector<16x128xf32>
    %150 = tpu.matmul %147, %149, %cst_98 {dimension_numbers = #tpu.dot_dimension_numbers<[1], [0], [0], [1], [0, 0, 1, 1], [], []>} : vector<16x32xf32>, vector<32x128xf32>, vector<16x128xf32> -> vector<16x128xf32>
    %151 = arith.addf %146, %150 : vector<16x128xf32>
    %152 = vector.extract_strided_slice %137 {offsets = [48, 0], sizes = [16, 32], strides = [1, 1]} : vector<80x32xf32> to vector<16x32xf32>
    %c3_99 = arith.constant 3 : index
    %c0_100 = arith.constant 0 : index
    %c0_101 = arith.constant 0 : index
    %153 = vector.load %arg3[%c3_99, %c0_100, %c0_101] : memref<5x32x128xf32, #tpu.memory_space<vmem>>, vector<1x32x128xf32>
    %154 = vector.shape_cast %153 : vector<1x32x128xf32> to vector<32x128xf32>
    %cst_102 = arith.constant dense<0.000000e+00> : vector<16x128xf32>
    %155 = tpu.matmul %152, %154, %cst_102 {dimension_numbers = #tpu.dot_dimension_numbers<[1], [0], [0], [1], [0, 0, 1, 1], [], []>} : vector<16x32xf32>, vector<32x128xf32>, vector<16x128xf32> -> vector<16x128xf32>
    %156 = arith.addf %151, %155 : vector<16x128xf32>
    %157 = vector.extract_strided_slice %137 {offsets = [64, 0], sizes = [16, 32], strides = [1, 1]} : vector<80x32xf32> to vector<16x32xf32>
    %c4_103 = arith.constant 4 : index
    %c0_104 = arith.constant 0 : index
    %c0_105 = arith.constant 0 : index
    %158 = vector.load %arg3[%c4_103, %c0_104, %c0_105] : memref<5x32x128xf32, #tpu.memory_space<vmem>>, vector<1x32x128xf32>
    %159 = vector.shape_cast %158 : vector<1x32x128xf32> to vector<32x128xf32>
    %cst_106 = arith.constant dense<0.000000e+00> : vector<16x128xf32>
    %160 = tpu.matmul %157, %159, %cst_106 {dimension_numbers = #tpu.dot_dimension_numbers<[1], [0], [0], [1], [0, 0, 1, 1], [], []>} : vector<16x32xf32>, vector<32x128xf32>, vector<16x128xf32> -> vector<16x128xf32>
    %161 = arith.addf %156, %160 : vector<16x128xf32>
    %c0_107 = arith.constant 0 : index
    %c0_108 = arith.constant 0 : index
    %162 = vector.load %arg4[%c0_107, %c0_108] : memref<1x128xf32, #tpu.memory_space<vmem>>, vector<1x128xf32>
    %163 = vector.broadcast %162 : vector<1x128xf32> to vector<16x128xf32>
    %164 = arith.mulf %161, %163 : vector<16x128xf32>
    %c0_109 = arith.constant 0 : index
    %c0_110 = arith.constant 0 : index
    %165 = vector.load %arg5[%c0_109, %c0_110] : memref<1x128xf32, #tpu.memory_space<vmem>>, vector<1x128xf32>
    %166 = vector.broadcast %165 : vector<1x128xf32> to vector<16x128xf32>
    %167 = arith.addf %164, %166 : vector<16x128xf32>
    %cst_111 = arith.constant 0.000000e+00 : f32
    %168 = vector.broadcast %cst_111 : f32 to vector<16x128xf32>
    %169 = arith.maximumf %167, %168 : vector<16x128xf32>
    %170 = vector.extract_strided_slice %169 {offsets = [0, 0], sizes = [14, 128], strides = [1, 1]} : vector<16x128xf32> to vector<14x128xf32>
    %171 = vector.extract_strided_slice %169 {offsets = [1, 0], sizes = [14, 128], strides = [1, 1]} : vector<16x128xf32> to vector<14x128xf32>
    %172 = arith.maximumf %170, %171 : vector<14x128xf32>
    %173 = vector.extract_strided_slice %169 {offsets = [2, 0], sizes = [14, 128], strides = [1, 1]} : vector<16x128xf32> to vector<14x128xf32>
    %174 = arith.maximumf %172, %173 : vector<14x128xf32>
    %175 = vector.extract_strided_slice %174 {offsets = [0, 0], sizes = [14, 112], strides = [1, 1]} : vector<14x128xf32> to vector<14x112xf32>
    %176 = vector.extract_strided_slice %174 {offsets = [0, 8], sizes = [14, 112], strides = [1, 1]} : vector<14x128xf32> to vector<14x112xf32>
    %177 = arith.maximumf %175, %176 : vector<14x112xf32>
    %178 = vector.extract_strided_slice %174 {offsets = [0, 16], sizes = [14, 112], strides = [1, 1]} : vector<14x128xf32> to vector<14x112xf32>
    %179 = arith.maximumf %177, %178 : vector<14x112xf32>
    %c0_112 = arith.constant 0 : index
    %c0_113 = arith.constant 0 : index
    %180 = vector.load %arg6[%c0_112, %c0_113] : memref<35x14xf32, #tpu.memory_space<vmem>>, vector<35x14xf32>
    %cst_114 = arith.constant dense<0.000000e+00> : vector<35x112xf32>
    %181 = tpu.matmul %180, %179, %cst_114 {dimension_numbers = #tpu.dot_dimension_numbers<[1], [0], [0], [1], [0, 0, 1, 1], [], []>} : vector<35x14xf32>, vector<14x112xf32>, vector<35x112xf32> -> vector<35x112xf32>
    %182 = vector.extract_strided_slice %181 {offsets = [0, 0], sizes = [7, 112], strides = [1, 1]} : vector<35x112xf32> to vector<7x112xf32>
    %c0_115 = arith.constant 0 : index
    %c0_116 = arith.constant 0 : index
    %c0_117 = arith.constant 0 : index
    %183 = vector.load %arg7[%c0_115, %c0_116, %c0_117] : memref<5x112x112xf32, #tpu.memory_space<vmem>>, vector<1x112x112xf32>
    %184 = vector.shape_cast %183 : vector<1x112x112xf32> to vector<112x112xf32>
    %cst_118 = arith.constant dense<0.000000e+00> : vector<7x112xf32>
    %185 = tpu.matmul %182, %184, %cst_118 {dimension_numbers = #tpu.dot_dimension_numbers<[1], [0], [0], [1], [0, 0, 1, 1], [], []>} : vector<7x112xf32>, vector<112x112xf32>, vector<7x112xf32> -> vector<7x112xf32>
    %186 = vector.extract_strided_slice %181 {offsets = [7, 0], sizes = [7, 112], strides = [1, 1]} : vector<35x112xf32> to vector<7x112xf32>
    %c1_119 = arith.constant 1 : index
    %c0_120 = arith.constant 0 : index
    %c0_121 = arith.constant 0 : index
    %187 = vector.load %arg7[%c1_119, %c0_120, %c0_121] : memref<5x112x112xf32, #tpu.memory_space<vmem>>, vector<1x112x112xf32>
    %188 = vector.shape_cast %187 : vector<1x112x112xf32> to vector<112x112xf32>
    %cst_122 = arith.constant dense<0.000000e+00> : vector<7x112xf32>
    %189 = tpu.matmul %186, %188, %cst_122 {dimension_numbers = #tpu.dot_dimension_numbers<[1], [0], [0], [1], [0, 0, 1, 1], [], []>} : vector<7x112xf32>, vector<112x112xf32>, vector<7x112xf32> -> vector<7x112xf32>
    %190 = arith.addf %185, %189 : vector<7x112xf32>
    %191 = vector.extract_strided_slice %181 {offsets = [14, 0], sizes = [7, 112], strides = [1, 1]} : vector<35x112xf32> to vector<7x112xf32>
    %c2_123 = arith.constant 2 : index
    %c0_124 = arith.constant 0 : index
    %c0_125 = arith.constant 0 : index
    %192 = vector.load %arg7[%c2_123, %c0_124, %c0_125] : memref<5x112x112xf32, #tpu.memory_space<vmem>>, vector<1x112x112xf32>
    %193 = vector.shape_cast %192 : vector<1x112x112xf32> to vector<112x112xf32>
    %cst_126 = arith.constant dense<0.000000e+00> : vector<7x112xf32>
    %194 = tpu.matmul %191, %193, %cst_126 {dimension_numbers = #tpu.dot_dimension_numbers<[1], [0], [0], [1], [0, 0, 1, 1], [], []>} : vector<7x112xf32>, vector<112x112xf32>, vector<7x112xf32> -> vector<7x112xf32>
    %195 = arith.addf %190, %194 : vector<7x112xf32>
    %196 = vector.extract_strided_slice %181 {offsets = [21, 0], sizes = [7, 112], strides = [1, 1]} : vector<35x112xf32> to vector<7x112xf32>
    %c3_127 = arith.constant 3 : index
    %c0_128 = arith.constant 0 : index
    %c0_129 = arith.constant 0 : index
    %197 = vector.load %arg7[%c3_127, %c0_128, %c0_129] : memref<5x112x112xf32, #tpu.memory_space<vmem>>, vector<1x112x112xf32>
    %198 = vector.shape_cast %197 : vector<1x112x112xf32> to vector<112x112xf32>
    %cst_130 = arith.constant dense<0.000000e+00> : vector<7x112xf32>
    %199 = tpu.matmul %196, %198, %cst_130 {dimension_numbers = #tpu.dot_dimension_numbers<[1], [0], [0], [1], [0, 0, 1, 1], [], []>} : vector<7x112xf32>, vector<112x112xf32>, vector<7x112xf32> -> vector<7x112xf32>
    %200 = arith.addf %195, %199 : vector<7x112xf32>
    %201 = vector.extract_strided_slice %181 {offsets = [28, 0], sizes = [7, 112], strides = [1, 1]} : vector<35x112xf32> to vector<7x112xf32>
    %c4_131 = arith.constant 4 : index
    %c0_132 = arith.constant 0 : index
    %c0_133 = arith.constant 0 : index
    %202 = vector.load %arg7[%c4_131, %c0_132, %c0_133] : memref<5x112x112xf32, #tpu.memory_space<vmem>>, vector<1x112x112xf32>
    %203 = vector.shape_cast %202 : vector<1x112x112xf32> to vector<112x112xf32>
    %cst_134 = arith.constant dense<0.000000e+00> : vector<7x112xf32>
    %204 = tpu.matmul %201, %203, %cst_134 {dimension_numbers = #tpu.dot_dimension_numbers<[1], [0], [0], [1], [0, 0, 1, 1], [], []>} : vector<7x112xf32>, vector<112x112xf32>, vector<7x112xf32> -> vector<7x112xf32>
    %205 = arith.addf %200, %204 : vector<7x112xf32>
    %c0_135 = arith.constant 0 : index
    %c0_136 = arith.constant 0 : index
    %206 = vector.load %arg8[%c0_135, %c0_136] : memref<1x112xf32, #tpu.memory_space<vmem>>, vector<1x112xf32>
    %207 = vector.broadcast %206 : vector<1x112xf32> to vector<7x112xf32>
    %208 = arith.mulf %205, %207 : vector<7x112xf32>
    %c0_137 = arith.constant 0 : index
    %c0_138 = arith.constant 0 : index
    %209 = vector.load %arg9[%c0_137, %c0_138] : memref<1x112xf32, #tpu.memory_space<vmem>>, vector<1x112xf32>
    %210 = vector.broadcast %209 : vector<1x112xf32> to vector<7x112xf32>
    %211 = arith.addf %208, %210 : vector<7x112xf32>
    %cst_139 = arith.constant 0.000000e+00 : f32
    %212 = vector.broadcast %cst_139 : f32 to vector<7x112xf32>
    %213 = arith.maximumf %211, %212 : vector<7x112xf32>
    %214 = vector.extract_strided_slice %213 {offsets = [0, 0], sizes = [5, 112], strides = [1, 1]} : vector<7x112xf32> to vector<5x112xf32>
    %215 = vector.extract_strided_slice %213 {offsets = [1, 0], sizes = [5, 112], strides = [1, 1]} : vector<7x112xf32> to vector<5x112xf32>
    %216 = arith.maximumf %214, %215 : vector<5x112xf32>
    %217 = vector.extract_strided_slice %213 {offsets = [2, 0], sizes = [5, 112], strides = [1, 1]} : vector<7x112xf32> to vector<5x112xf32>
    %218 = arith.maximumf %216, %217 : vector<5x112xf32>
    %219 = vector.extract_strided_slice %218 {offsets = [0, 0], sizes = [5, 80], strides = [1, 1]} : vector<5x112xf32> to vector<5x80xf32>
    %220 = vector.extract_strided_slice %218 {offsets = [0, 16], sizes = [5, 80], strides = [1, 1]} : vector<5x112xf32> to vector<5x80xf32>
    %221 = arith.maximumf %219, %220 : vector<5x80xf32>
    %222 = vector.extract_strided_slice %218 {offsets = [0, 32], sizes = [5, 80], strides = [1, 1]} : vector<5x112xf32> to vector<5x80xf32>
    %223 = arith.maximumf %221, %222 : vector<5x80xf32>
    %c0_140 = arith.constant 0 : index
    %c0_141 = arith.constant 0 : index
    %224 = vector.load %arg10[%c0_140, %c0_141] : memref<15x5xf32, #tpu.memory_space<vmem>>, vector<15x5xf32>
    %cst_142 = arith.constant dense<0.000000e+00> : vector<15x80xf32>
    %225 = tpu.matmul %224, %223, %cst_142 {dimension_numbers = #tpu.dot_dimension_numbers<[1], [0], [0], [1], [0, 0, 1, 1], [], []>} : vector<15x5xf32>, vector<5x80xf32>, vector<15x80xf32> -> vector<15x80xf32>
    %226 = vector.extract_strided_slice %225 {offsets = [0, 0], sizes = [3, 80], strides = [1, 1]} : vector<15x80xf32> to vector<3x80xf32>
    %c0_143 = arith.constant 0 : index
    %c0_144 = arith.constant 0 : index
    %c0_145 = arith.constant 0 : index
    %227 = vector.load %arg11[%c0_143, %c0_144, %c0_145] : memref<5x80x48xf32, #tpu.memory_space<vmem>>, vector<1x80x48xf32>
    %228 = vector.shape_cast %227 : vector<1x80x48xf32> to vector<80x48xf32>
    %cst_146 = arith.constant dense<0.000000e+00> : vector<3x48xf32>
    %229 = tpu.matmul %226, %228, %cst_146 {dimension_numbers = #tpu.dot_dimension_numbers<[1], [0], [0], [1], [0, 0, 1, 1], [], []>} : vector<3x80xf32>, vector<80x48xf32>, vector<3x48xf32> -> vector<3x48xf32>
    %230 = vector.extract_strided_slice %225 {offsets = [3, 0], sizes = [3, 80], strides = [1, 1]} : vector<15x80xf32> to vector<3x80xf32>
    %c1_147 = arith.constant 1 : index
    %c0_148 = arith.constant 0 : index
    %c0_149 = arith.constant 0 : index
    %231 = vector.load %arg11[%c1_147, %c0_148, %c0_149] : memref<5x80x48xf32, #tpu.memory_space<vmem>>, vector<1x80x48xf32>
    %232 = vector.shape_cast %231 : vector<1x80x48xf32> to vector<80x48xf32>
    %cst_150 = arith.constant dense<0.000000e+00> : vector<3x48xf32>
    %233 = tpu.matmul %230, %232, %cst_150 {dimension_numbers = #tpu.dot_dimension_numbers<[1], [0], [0], [1], [0, 0, 1, 1], [], []>} : vector<3x80xf32>, vector<80x48xf32>, vector<3x48xf32> -> vector<3x48xf32>
    %234 = arith.addf %229, %233 : vector<3x48xf32>
    %235 = vector.extract_strided_slice %225 {offsets = [6, 0], sizes = [3, 80], strides = [1, 1]} : vector<15x80xf32> to vector<3x80xf32>
    %c2_151 = arith.constant 2 : index
    %c0_152 = arith.constant 0 : index
    %c0_153 = arith.constant 0 : index
    %236 = vector.load %arg11[%c2_151, %c0_152, %c0_153] : memref<5x80x48xf32, #tpu.memory_space<vmem>>, vector<1x80x48xf32>
    %237 = vector.shape_cast %236 : vector<1x80x48xf32> to vector<80x48xf32>
    %cst_154 = arith.constant dense<0.000000e+00> : vector<3x48xf32>
    %238 = tpu.matmul %235, %237, %cst_154 {dimension_numbers = #tpu.dot_dimension_numbers<[1], [0], [0], [1], [0, 0, 1, 1], [], []>} : vector<3x80xf32>, vector<80x48xf32>, vector<3x48xf32> -> vector<3x48xf32>
    %239 = arith.addf %234, %238 : vector<3x48xf32>
    %240 = vector.extract_strided_slice %225 {offsets = [9, 0], sizes = [3, 80], strides = [1, 1]} : vector<15x80xf32> to vector<3x80xf32>
    %c3_155 = arith.constant 3 : index
    %c0_156 = arith.constant 0 : index
    %c0_157 = arith.constant 0 : index
    %241 = vector.load %arg11[%c3_155, %c0_156, %c0_157] : memref<5x80x48xf32, #tpu.memory_space<vmem>>, vector<1x80x48xf32>
    %242 = vector.shape_cast %241 : vector<1x80x48xf32> to vector<80x48xf32>
    %cst_158 = arith.constant dense<0.000000e+00> : vector<3x48xf32>
    %243 = tpu.matmul %240, %242, %cst_158 {dimension_numbers = #tpu.dot_dimension_numbers<[1], [0], [0], [1], [0, 0, 1, 1], [], []>} : vector<3x80xf32>, vector<80x48xf32>, vector<3x48xf32> -> vector<3x48xf32>
    %244 = arith.addf %239, %243 : vector<3x48xf32>
    %245 = vector.extract_strided_slice %225 {offsets = [12, 0], sizes = [3, 80], strides = [1, 1]} : vector<15x80xf32> to vector<3x80xf32>
    %c4_159 = arith.constant 4 : index
    %c0_160 = arith.constant 0 : index
    %c0_161 = arith.constant 0 : index
    %246 = vector.load %arg11[%c4_159, %c0_160, %c0_161] : memref<5x80x48xf32, #tpu.memory_space<vmem>>, vector<1x80x48xf32>
    %247 = vector.shape_cast %246 : vector<1x80x48xf32> to vector<80x48xf32>
    %cst_162 = arith.constant dense<0.000000e+00> : vector<3x48xf32>
    %248 = tpu.matmul %245, %247, %cst_162 {dimension_numbers = #tpu.dot_dimension_numbers<[1], [0], [0], [1], [0, 0, 1, 1], [], []>} : vector<3x80xf32>, vector<80x48xf32>, vector<3x48xf32> -> vector<3x48xf32>
    %249 = arith.addf %244, %248 : vector<3x48xf32>
    %c0_163 = arith.constant 0 : index
    %c0_164 = arith.constant 0 : index
    %250 = vector.load %arg12[%c0_163, %c0_164] : memref<1x48xf32, #tpu.memory_space<vmem>>, vector<1x48xf32>
    %251 = vector.broadcast %250 : vector<1x48xf32> to vector<3x48xf32>
    %252 = arith.mulf %249, %251 : vector<3x48xf32>
    %c0_165 = arith.constant 0 : index
    %c0_166 = arith.constant 0 : index
    %253 = vector.load %arg13[%c0_165, %c0_166] : memref<1x48xf32, #tpu.memory_space<vmem>>, vector<1x48xf32>
    %254 = vector.broadcast %253 : vector<1x48xf32> to vector<3x48xf32>
    %255 = arith.addf %252, %254 : vector<3x48xf32>
    %cst_167 = arith.constant 0.000000e+00 : f32
    %256 = vector.broadcast %cst_167 : f32 to vector<3x48xf32>
    %257 = arith.maximumf %255, %256 : vector<3x48xf32>
    %258 = vector.extract_strided_slice %257 {offsets = [0, 0], sizes = [1, 48], strides = [1, 1]} : vector<3x48xf32> to vector<1x48xf32>
    %259 = vector.extract_strided_slice %257 {offsets = [1, 0], sizes = [1, 48], strides = [1, 1]} : vector<3x48xf32> to vector<1x48xf32>
    %260 = arith.maximumf %258, %259 : vector<1x48xf32>
    %261 = vector.extract_strided_slice %257 {offsets = [2, 0], sizes = [1, 48], strides = [1, 1]} : vector<3x48xf32> to vector<1x48xf32>
    %262 = arith.maximumf %260, %261 : vector<1x48xf32>
    %263 = vector.extract_strided_slice %262 {offsets = [0, 0], sizes = [1, 16], strides = [1, 1]} : vector<1x48xf32> to vector<1x16xf32>
    %264 = vector.extract_strided_slice %262 {offsets = [0, 16], sizes = [1, 16], strides = [1, 1]} : vector<1x48xf32> to vector<1x16xf32>
    %265 = arith.maximumf %263, %264 : vector<1x16xf32>
    %266 = vector.extract_strided_slice %262 {offsets = [0, 32], sizes = [1, 16], strides = [1, 1]} : vector<1x48xf32> to vector<1x16xf32>
    %267 = arith.maximumf %265, %266 : vector<1x16xf32>
    %268 = tpu.concatenate %133, %267 in 0 : vector<1x16xf32>, vector<1x16xf32> -> vector<2x16xf32>
    %c0_168 = arith.constant 0 : index
    %c0_169 = arith.constant 0 : index
    %269 = vector.load %arg14[%c0_168, %c0_169] : memref<16x32xf32, #tpu.memory_space<vmem>>, vector<16x32xf32>
    %cst_170 = arith.constant dense<0.000000e+00> : vector<2x32xf32>
    %270 = tpu.matmul %268, %269, %cst_170 {dimension_numbers = #tpu.dot_dimension_numbers<[1], [0], [0], [1], [0, 0, 1, 1], [], []>} : vector<2x16xf32>, vector<16x32xf32>, vector<2x32xf32> -> vector<2x32xf32>
    %c0_171 = arith.constant 0 : index
    %c0_172 = arith.constant 0 : index
    %271 = vector.load %arg15[%c0_171, %c0_172] : memref<1x32xf32, #tpu.memory_space<vmem>>, vector<1x32xf32>
    %272 = vector.broadcast %271 : vector<1x32xf32> to vector<2x32xf32>
    %273 = arith.addf %270, %272 : vector<2x32xf32>
    %cst_173 = arith.constant 0.000000e+00 : f32
    %274 = vector.broadcast %cst_173 : f32 to vector<2x32xf32>
    %275 = arith.maximumf %273, %274 : vector<2x32xf32>
    %c0_174 = arith.constant 0 : index
    %c0_175 = arith.constant 0 : index
    %276 = vector.load %arg16[%c0_174, %c0_175] : memref<32x32xf32, #tpu.memory_space<vmem>>, vector<32x32xf32>
    %cst_176 = arith.constant dense<0.000000e+00> : vector<2x32xf32>
    %277 = tpu.matmul %275, %276, %cst_176 {dimension_numbers = #tpu.dot_dimension_numbers<[1], [0], [0], [1], [0, 0, 1, 1], [], []>} : vector<2x32xf32>, vector<32x32xf32>, vector<2x32xf32> -> vector<2x32xf32>
    %c0_177 = arith.constant 0 : index
    %c0_178 = arith.constant 0 : index
    %278 = vector.load %arg17[%c0_177, %c0_178] : memref<1x32xf32, #tpu.memory_space<vmem>>, vector<1x32xf32>
    %279 = vector.broadcast %278 : vector<1x32xf32> to vector<2x32xf32>
    %280 = arith.addf %277, %279 : vector<2x32xf32>
    %cst_179 = arith.constant 0.000000e+00 : f32
    %281 = vector.broadcast %cst_179 : f32 to vector<2x32xf32>
    %282 = arith.maximumf %280, %281 : vector<2x32xf32>
    %c0_180 = arith.constant 0 : index
    %c0_181 = arith.constant 0 : index
    %283 = vector.load %arg18[%c0_180, %c0_181] : memref<2x32xf32, #tpu.memory_space<vmem>>, vector<2x32xf32>
    tpu.vector_store %arg18[%c0_180, %c0_181], %282 {strides = array<i32>} : memref<2x32xf32, #tpu.memory_space<vmem>>, vector<2x32xf32>,
    return
  }
  func.func @transform_0(%arg0: i32) -> (i32, i32, i32) {
    %c0_i32 = arith.constant 0 : i32
    %c0_i32_0 = arith.constant 0 : i32
    %c0_i32_1 = arith.constant 0 : i32
    %c0_i32_2 = arith.constant 0 : i32
    return %c0_i32, %c0_i32_0, %c0_i32_1 : i32, i32, i32
  }
  func.func @transform_1(%arg0: i32) -> (i32, i32) {
    %c0_i32 = arith.constant 0 : i32
    %c0_i32_0 = arith.constant 0 : i32
    %c0_i32_1 = arith.constant 0 : i32
    return %c0_i32, %c0_i32_0 : i32, i32
  }
  func.func @transform_2(%arg0: i32) -> (i32, i32, i32) {
    %c0_i32 = arith.constant 0 : i32
    %c0_i32_0 = arith.constant 0 : i32
    %c0_i32_1 = arith.constant 0 : i32
    %c0_i32_2 = arith.constant 0 : i32
    return %c0_i32, %c0_i32_0, %c0_i32_1 : i32, i32, i32
  }
  func.func @transform_3(%arg0: i32) -> (i32, i32) {
    %c0_i32 = arith.constant 0 : i32
    %c0_i32_0 = arith.constant 0 : i32
    %c0_i32_1 = arith.constant 0 : i32
    return %c0_i32, %c0_i32_0 : i32, i32
  }
  func.func @transform_4(%arg0: i32) -> (i32, i32) {
    %c0_i32 = arith.constant 0 : i32
    %c0_i32_0 = arith.constant 0 : i32
    %c0_i32_1 = arith.constant 0 : i32
    return %c0_i32, %c0_i32_0 : i32, i32
  }
  func.func @transform_5(%arg0: i32) -> (i32, i32) {
    %c0_i32 = arith.constant 0 : i32
    %c0_i32_0 = arith.constant 0 : i32
    %c0_i32_1 = arith.constant 0 : i32
    return %c0_i32, %c0_i32_0 : i32, i32
  }
  func.func @transform_6(%arg0: i32) -> (i32, i32, i32) {
    %c0_i32 = arith.constant 0 : i32
    %c0_i32_0 = arith.constant 0 : i32
    %c0_i32_1 = arith.constant 0 : i32
    %c0_i32_2 = arith.constant 0 : i32
    return %c0_i32, %c0_i32_0, %c0_i32_1 : i32, i32, i32
  }
  func.func @transform_7(%arg0: i32) -> (i32, i32) {
    %c0_i32 = arith.constant 0 : i32
    %c0_i32_0 = arith.constant 0 : i32
    %c0_i32_1 = arith.constant 0 : i32
    return %c0_i32, %c0_i32_0 : i32, i32
  }
  func.func @transform_8(%arg0: i32) -> (i32, i32) {
    %c0_i32 = arith.constant 0 : i32
    %c0_i32_0 = arith.constant 0 : i32
    %c0_i32_1 = arith.constant 0 : i32
    return %c0_i32, %c0_i32_0 : i32, i32
  }
  func.func @transform_9(%arg0: i32) -> (i32, i32) {
    %c0_i32 = arith.constant 0 : i32
    %c0_i32_0 = arith.constant 0 : i32
    %c0_i32_1 = arith.constant 0 : i32
    return %c0_i32, %c0_i32_0 : i32, i32
  }
  func.func @transform_10(%arg0: i32) -> (i32, i32, i32) {
    %c0_i32 = arith.constant 0 : i32
    %c0_i32_0 = arith.constant 0 : i32
    %c0_i32_1 = arith.constant 0 : i32
    %c0_i32_2 = arith.constant 0 : i32
    return %c0_i32, %c0_i32_0, %c0_i32_1 : i32, i32, i32
  }
  func.func @transform_11(%arg0: i32) -> (i32, i32) {
    %c0_i32 = arith.constant 0 : i32
    %c0_i32_0 = arith.constant 0 : i32
    %c0_i32_1 = arith.constant 0 : i32
    return %c0_i32, %c0_i32_0 : i32, i32
  }
  func.func @transform_12(%arg0: i32) -> (i32, i32) {
    %c0_i32 = arith.constant 0 : i32
    %c0_i32_0 = arith.constant 0 : i32
    %c0_i32_1 = arith.constant 0 : i32
    return %c0_i32, %c0_i32_0 : i32, i32
  }
  func.func @transform_13(%arg0: i32) -> (i32, i32) {
    %c0_i32 = arith.constant 0 : i32
    %c0_i32_0 = arith.constant 0 : i32
    %c0_i32_1 = arith.constant 0 : i32
    return %c0_i32, %c0_i32_0 : i32, i32
  }
  func.func @transform_14(%arg0: i32) -> (i32, i32) {
    %c0_i32 = arith.constant 0 : i32
    %c0_i32_0 = arith.constant 0 : i32
    %c0_i32_1 = arith.constant 0 : i32
    return %c0_i32, %c0_i32_0 : i32, i32
  }
  func.func @transform_15(%arg0: i32) -> (i32, i32) {
    %c0_i32 = arith.constant 0 : i32
    %c0_i32_0 = arith.constant 0 : i32
    %c0_i32_1 = arith.constant 0 : i32
    return %c0_i32, %c0_i32_0 : i32, i32
  }
  func.func @transform_16(%arg0: i32) -> (i32, i32) {
    %c0_i32 = arith.constant 0 : i32
    %c0_i32_0 = arith.constant 0 : i32
    %c0_i32_1 = arith.constant 0 : i32
    return %c0_i32, %c0_i32_0 : i32, i32
  }
  func.func @transform_17(%arg0: i32) -> (i32, i32) {
    %c0_i32 = arith.constant 0 : i32
    %c0_i32_0 = arith.constant 0 : i32
    %c0_i32_1 = arith.constant 0 : i32
    return %c0_i32, %c0_i32_0 : i32, i32
  }
}

</mosaic_0001>

<bundles_post_ra>
// kernel: cnn_forward.1
= control target key start
LH: loop header
LB: loop body
LE: loop exit
PB: predicated region body
PF: predicated region fallthrough
CT: control target
= control target key end

     0   :  { %s7117_s0 = inlined_call_operand.vmem [shape: f32[2,32,32], index: 0, kind: input, shape index: {}]   ;;  %s7118_s1 = inlined_call_operand.vmem [shape: f32[80,32], index: 1, kind: input, shape index: {}]   ;;  %s7119_s2 = inlined_call_operand.vmem [shape: f32[5,32,128], index: 2, kind: input, shape index: {}]   ;;  %s7120_s3 = inlined_call_operand.vmem [shape: f32[1,128], index: 3, kind: input, shape index: {}]   ;;  %s7121_s4 = inlined_call_operand.vmem [shape: f32[1,128], index: 4, kind: input, shape index: {}]   ;;  %s7122_s5 = inlined_call_operand.vmem [shape: f32[35,14], index: 5, kind: input, shape index: {}]   ;;  %s7123_s6 = inlined_call_operand.vmem [shape: f32[5,112,112], index: 6, kind: input, shape index: {}]   ;;  %s7124_s7 = inlined_call_operand.hbm [shape: f32[1,112], index: 7, kind: input, shape index: {}]   ;;  %s7125_s8 = inlined_call_operand.vmem [shape: f32[1,112], index: 8, kind: input, shape index: {}]   ;;  %s7126_s9 = inlined_call_operand.vmem [shape: f32[15,5], index: 9, kind: input, shape index: {}]   ;;  %s7127_s10 = inlined_call_operand.vmem [shape: f32[5,80,48], index: 10, kind: input, shape index: {}]   ;;  %s7128_s11 = inlined_call_operand.hbm [shape: f32[1,48], index: 11, kind: input, shape index: {}]   ;;  %s7129_s12 = inlined_call_operand.vmem [shape: f32[1,48], index: 12, kind: input, shape index: {}]   ;;  %s7130_s13 = inlined_call_operand.hbm [shape: f32[16,32], index: 13, kind: input, shape index: {}]   ;;  %s7131_s14 = inlined_call_operand.hbm [shape: f32[1,32], index: 14, kind: input, shape index: {}]   ;;  %s7132_s15 = inlined_call_operand.vmem [shape: f32[32,32], index: 15, kind: input, shape index: {}]   ;;  %s7133_s16 = inlined_call_operand.hbm [shape: f32[1,32], index: 16, kind: input, shape index: {}]   ;;  %s7134_s17 = inlined_call_operand.hbm [shape: f32[2,32], index: 17, kind: output, shape index: {}]  }
   0x1   :  { %7171 = sst [smem:[#allocation46_spill]] %s7117_s0 }
   0x2   :  { %7172 = sst [smem:[#allocation47_spill]] %s7118_s1 }
   0x3   :  { %22 = vsyncpa [#allocation3], 0 }
   0x4   :  { %23 = vsyncpa [#allocation6], 0 }
   0x5   :  { %24 = vsyncpa [#allocation9], 0 }
   0x6   :  { %25 = vsyncpa [#allocation4], 0  ;;  %s5694_s24 = smov [#allocation5]   ;;  %s5695_s26 = smov [#allocation8]  }
   0x7   :  { %s62_s25 = sshll.u32 %s5694_s24, 4  ;;  %s86_s27 = sshll.u32 %s5695_s26, 4  ;;  %s63_s25 = int_to_ptr.vmem [resolvable:$true] %s62_s25  ;;  %s87_s27 = int_to_ptr.vmem [resolvable:$true] %s86_s27 }
   0x8   :  { %s5554_s0 = scalar_lea.hbm %s7128_s11, 16 }
   0x9   :  { %p5555_p0 = scmp.ne.s32.totalorder %s7128_s11, %s5554_s0  ;;  %p5558_p1 = scmp.lt.u32.totalorder %s5554_s0, %s7128_s11 }
   0xb   :  { %p5560_p2 = pnand %p5558_p1, %p5555_p0 }
   0xd   :  { %5563 = shalt.err (!%p5560_p2)
}
   0xe   :  { %s5564_s20 = scalar_lea.vmem %s63_s25, 16  ;;  %s5568_s21 = scalar_lea.vmem %s63_s25, 32 }
   0xf   :  { %p5565_p3 = scmp.ne.s32.totalorder %s63_s25, %s5564_s20  ;;  %p5569_p4 = scmp.lt.s32.totalorder %s63_s25, %s63_s25 }
  0x10   :  { %p5570_p5 = scmp.lt.s32.totalorder %s5568_s21, %s5564_s20 }
  0x12   :  { %p5571_p6 = por %p5570_p5, %p5569_p4 }
  0x14   :  { %p5572_p7 = pnand %p5571_p6, %p5565_p3 }
  0x16   :  { %5575 = shalt.err (!%p5572_p7)
}
  0x17   :  { %65 = dma.hbm_to_vmem [thread:$0]  %s7128_s11, 16, %s63_s25, [#allocation6]  }
  0x18   :  { %s5576_s28 = scalar_lea.hbm %s7131_s14, 16 }
  0x19   :  { %p5577_p8 = scmp.ne.s32.totalorder %s7131_s14, %s5576_s28  ;;  %p5580_p9 = scmp.lt.u32.totalorder %s5576_s28, %s7131_s14 }
  0x1b   :  { %p5582_p10 = pnand %p5580_p9, %p5577_p8 }
  0x1d   :  { %5585 = shalt.err (!%p5582_p10)
}
  0x1e   :  { %s5586_s19 = scalar_lea.vmem %s87_s27, 16  ;;  %s5590_s1 = scalar_lea.vmem %s87_s27, 32 }
  0x1f   :  { %p5587_p11 = scmp.ne.s32.totalorder %s87_s27, %s5586_s19  ;;  %p5591_p12 = scmp.lt.s32.totalorder %s87_s27, %s87_s27 }
  0x20   :  { %p5592_p13 = scmp.lt.s32.totalorder %s5590_s1, %s5586_s19 }
  0x22   :  { %p5593_p0 = por %p5592_p13, %p5591_p12 }
  0x24   :  { %p5594_p1 = pnand %p5593_p0, %p5587_p11 }
  0x26   :  { %5597 = shalt.err (!%p5594_p1)
}
  0x27   :  { %89 = dma.hbm_to_vmem [thread:$0]  %s7131_s14, 16, %s87_s27, [#allocation9]  }
  0x28   :  { %s5696_s20 = smov [#allocation2]   ;;  %s5697_s22 = smov [#allocation7]  }
  0x29   :  { %s46_s21 = sshll.u32 %s5696_s20, 4  ;;  %s73_s23 = sshll.u32 %s5697_s22, 4  ;;  %s47_s21 = int_to_ptr.vmem [resolvable:$true] %s46_s21  ;;  %s5823_s23 = int_to_ptr.vmem [resolvable:$true] %s73_s23 }
  0x2a   :  { %s5598_s28 = scalar_lea.hbm %s7124_s7, 16 }
  0x2b   :  { %p5599_p2 = scmp.ne.s32.totalorder %s7124_s7, %s5598_s28  ;;  %p5602_p3 = scmp.lt.u32.totalorder %s5598_s28, %s7124_s7 }
  0x2d   :  { %p5604_p4 = pnand %p5602_p3, %p5599_p2 }
  0x2f   :  { %5607 = shalt.err (!%p5604_p4)
}
  0x30   :  { %s5608_s14 = scalar_lea.vmem %s47_s21, 16  ;;  %s5612_s27 = scalar_lea.vmem %s47_s21, 32 }
  0x31   :  { %p5609_p5 = scmp.ne.s32.totalorder %s47_s21, %s5608_s14  ;;  %p5613_p6 = scmp.lt.s32.totalorder %s47_s21, %s47_s21 }
  0x32   :  { %p5614_p7 = scmp.lt.s32.totalorder %s5612_s27, %s5608_s14 }
  0x34   :  { %p5615_p8 = por %p5614_p7, %p5613_p6 }
  0x36   :  { %p5616_p9 = pnand %p5615_p8, %p5609_p5 }
  0x38   :  { %5619 = shalt.err (!%p5616_p9)
}
  0x39   :  { %49 = dma.hbm_to_vmem [thread:$0]  %s7124_s7, 16, %s47_s21, [#allocation3]  }
  0x3a   :  { %s5620_s20 = scalar_lea.hbm %s7130_s13, 256 }
  0x3b   :  { %p5621_p10 = scmp.ne.s32.totalorder %s7130_s13, %s5620_s20  ;;  %p5624_p11 = scmp.lt.u32.totalorder %s5620_s20, %s7130_s13 }
  0x3d   :  { %p5626_p12 = pnand %p5624_p11, %p5621_p10 }
  0x3f   :  { %5629 = shalt.err (!%p5626_p12)
}
  0x40   :  { %s5630_s29 = scalar_lea.vmem %s5823_s23, 256  ;;  %p5635_p0 = scmp.lt.s32.totalorder %s5823_s23, %s5823_s23 }
  0x41   :  { %p5631_p13 = scmp.ne.s32.totalorder %s5823_s23, %s5630_s29  ;;  %p5636_p1 = scmp.lt.s32.totalorder %s5630_s29, %s5630_s29 }
  0x43   :  { %p5637_p2 = por %p5636_p1, %p5635_p0 }
  0x45   :  { %p5638_p3 = pnand %p5637_p2, %p5631_p13 }
  0x47   :  { %5641 = shalt.err (!%p5638_p3)
}
  0x48   :  { %s5698_s7 = smov 128   ;;  %s5699_s21 = smov 8  }
  0x49   :  { %79 = dma.hbm_to_vmem [thread:$0]  %s7130_s13, 256, %s5823_s23, [#allocation6], %s5698_s7, %s5698_s7, %s5699_s21  }
  0x4a   :  { %s5700_s18 = smov [#allocation10]   ;;  %s5642_s1 = scalar_lea.hbm %s7133_s16, 16 }
  0x4b   :  { %s98_s14 = sshll.u32 %s5700_s18, 4  ;;  %p5643_p4 = scmp.ne.s32.totalorder %s7133_s16, %s5642_s1  ;;  %s99_s14 = int_to_ptr.vmem [resolvable:$true] %s98_s14 }
  0x4c   :  { %p5646_p5 = scmp.lt.u32.totalorder %s5642_s1, %s7133_s16 }
  0x4e   :  { %p5648_p6 = pnand %p5646_p5, %p5643_p4 }
  0x50   :  { %5651 = shalt.err (!%p5648_p6)
}
  0x51   :  { %s5652_s24 = scalar_lea.vmem %s99_s14, 16  ;;  %s5656_s13 = scalar_lea.vmem %s99_s14, 32 }
  0x52   :  { %p5653_p7 = scmp.ne.s32.totalorder %s99_s14, %s5652_s24  ;;  %p5657_p8 = scmp.lt.s32.totalorder %s99_s14, %s99_s14 }
  0x53   :  { %p5658_p9 = scmp.lt.s32.totalorder %s5656_s13, %s5652_s24 }
  0x55   :  { %p5659_p10 = por %p5658_p9, %p5657_p8 }
  0x57   :  { %p5660_p11 = pnand %p5659_p10, %p5653_p7 }
  0x59   :  { %5663 = shalt.err (!%p5660_p11)
}
  0x5a   :  { %101 = dma.hbm_to_vmem [thread:$0]  %s7133_s16, 16, %s99_s14, [#allocation9]  }
  0x5b   :  { %5686 = dma.done.wait [#allocation3], 16  }
  0x5c   :  { %5687 = vsyncadd [#allocation3], 4294967280 }
  0x5d   :  { %5688 = dma.done.wait [#allocation6], 272  }
  0x5e   :  { %5689 = vsyncadd [#allocation6], 4294967024 }
  0x5f   :  { %5690 = dma.done.wait [#allocation9], 32  }
  0x60   :  { %5691 = vsyncadd [#allocation9], 4294967264  ;;  %vm131_vm0 = vcmask 261120   ;;  %s7173_s7 = sld [smem:[#allocation46_spill]]  ;;  %s7174_s1 = sld [smem:[#allocation47_spill]]  ;;  %v3654_v7 = vld [vmem:[%s7119_s2 + $0x20] sm:$0xff] }
  0x61   :  { %v3655_v8 = vld [vmem:[%s7119_s2 + $0x28] sm:$0xff]  ;;  %v3656_v19 = vld [vmem:[%s7119_s2 + $0x30] sm:$0xff]  ;;  %v3657_v20 = vld [vmem:[%s7119_s2 + $0x38] sm:$0xff]  ;;  %vm734_vm1 = vcmask 1046528   ;;  %vm742_vm2 = vcmask 1045504   ;;  %vm5702_vm3 = vmmov 0  }
  0x62   :  { %v5888_v9 = vpack.c.bf16 %v3655_v8, %v3654_v7  ;;  %v5934_v21 = vpack.c.bf16 %v3657_v20, %v3656_v19  ;;  %v277_v22 = vld [vmem:[%s7119_s2] sm:$0xff]  ;;  %v278_v23 = vld [vmem:[%s7119_s2 + $0x8] sm:$0xff]  ;;  %v279_v27 = vld [vmem:[%s7119_s2 + $0x10] sm:$0xff]  ;;  %s5704_s26 = smov 120   ;;  %s5705_s28 = smov 112   ;;  %vm5706_vm4 = vmmov 1  }
  0x63   :  { %v5944_v24 = vpack.c.bf16 %v278_v23, %v277_v22  ;;  %v280_v28 = vld [vmem:[%s7119_s2 + $0x18] sm:$0xff]  ;;  %v3662_v32 = vld [vmem:[%s7119_s2 + $0x40] sm:$0xff]  ;;  %v3663_v33 = vld [vmem:[%s7119_s2 + $0x48] sm:$0xff]  ;;  %vm773_vm6 = vcmask 113664   ;;  %vm913_vm7 = vcmask 1040384   ;;  %vm917_vm8 = vcmask 916480  }
  0x64   :  { %4995 = vmatprep.subr.bf16.mxu1 %v5888_v9  ;;  %v5953_v31 = vpack.c.bf16 %v280_v28, %v279_v27  ;;  %v5966_v35 = vpack.c.bf16 %v3663_v33, %v3662_v32  ;;  %v3664_v37 = vld [vmem:[%s7119_s2 + $0x50] sm:$0xff]  ;;  %v3665_v38 = vld [vmem:[%s7119_s2 + $0x58] sm:$0xff]  ;;  %v3668_v42 = vld [vmem:[%s7119_s2 + $0x60] sm:$0xff]  ;;  %vm1078_vm9 = vcmask 1041408   ;;  %vm1171_vm10 = vcmask 1042432   ;;  %s5708_s18 = smov [#allocation11]  }
  0x65   :  { %4997 = vmatpush3.bf16.msra.mxu1 %v5888_v9  ;;  %v5976_v40 = vpack.c.bf16 %v3665_v38, %v3664_v37  ;;  %v3669_v43 = vld [vmem:[%s7119_s2 + $0x68] sm:$0xff]  ;;  %v3670_v47 = vld [vmem:[%s7119_s2 + $0x70] sm:$0xff]  ;;  %v3671_v48 = vld [vmem:[%s7119_s2 + $0x78] sm:$0xff]  ;;  %vm1264_vm11 = vcmask 1043456   ;;  %vm1376_vm12 = vcmask 39936   ;;  %vm1383_vm13 = vcmask 1044480  }
  0x66   :  { %v117_v0 = vld [vmem:[%s7173_s7] sm:$0xff]  ;;  %v118_v1 = vld [vmem:[%s7173_s7 + $0x8] sm:$0xff]  ;;  %v119_v2 = vld [vmem:[%s7173_s7 + $0x10] sm:$0xff]  ;;  %4999 = vmatprep.subr.bf16.mxu1 %v5934_v21  ;;  %v5988_v45 = vpack.c.bf16 %v3669_v43, %v3668_v42  ;;  %v5998_v49 = vpack.c.bf16 %v3671_v48, %v3670_v47  ;;  %vm1485_vm14 = vcmask 654336   ;;  %vm3465_vm15 = vcmask 130048   ;;  %s3633_s16 = sshll.u32 %s5708_s18, 4  ;;  %s3634_s16 = int_to_ptr.vmem [resolvable:$true] %s3633_s16 }
  0x67   :  { %v4986_v3 = vpack.c.bf16 %v118_v1, %v117_v0  ;;  %v120_v4 = vld [vmem:[%s7173_s7 + $0x18] sm:$0xff]  ;;  %v121_v5 = vld [vmem:[%s7174_s1] sm:$0xff]  ;;  %v122_v10 = vld [vmem:[%s7174_s1 + $0x8] sm:$0xff]  ;;  %p5669_p13 = scmp.lt.s32.totalorder %s3634_s16, %s3634_s16 }
  0x68   :  { %v4990_v6 = vpack.c.bf16 %v120_v4, %v119_v2  ;;  %4232 = vmatprep.mubr.msk.f32.mxu0 %vm131_vm0, %v121_v5  ;;  %v123_v11 = vld [vmem:[%s7174_s1 + $0x10] sm:$0xff]  ;;  %v124_v12 = vld [vmem:[%s7174_s1 + $0x18] sm:$0xff]  ;;  %v125_v13 = vld [vmem:[%s7174_s1 + $0x20] sm:$0xff] }
  0x69   :  { %4987 = vmatprep.subr.bf16.mxu0 %v4986_v3  ;;  %v126_v14 = vld [vmem:[%s7174_s1 + $0x28] sm:$0xff]  ;;  %v127_v15 = vld [vmem:[%s7174_s1 + $0x30] sm:$0xff]  ;;  %v128_v16 = vld [vmem:[%s7174_s1 + $0x38] sm:$0xff]  ;;  %5001 = vmatpush3.bf16.msra.mxu1 %v5934_v21 }
  0x6a   :  { %4989 = vmatpush3.bf16.msra.mxu0 %v4986_v3  ;;  %v129_v17 = vld [vmem:[%s7174_s1 + $0x40] sm:$0xff]  ;;  %v130_v18 = vld [vmem:[%s7174_s1 + $0x48] sm:$0xff]  ;;  %5003 = vmatprep.subr.bf16.mxu1 %v5944_v24  ;;  %v3676_v53 = vld [vmem:[%s7119_s2 + $0x90] sm:$0xff] }
  0x6b   :  { %4991 = vmatprep.subr.bf16.mxu0 %v4990_v6  ;;  %v3674_v50 = vld [vmem:[%s7119_s2 + $0x80] sm:$0xff]  ;;  %v3675_v51 = vld [vmem:[%s7119_s2 + $0x88] sm:$0xff]  ;;  %v3677_v54 = vld [vmem:[%s7119_s2 + $0x98] sm:$0xff] }
  0x6c   :  { %v6010_v52 = vpack.c.bf16 %v3675_v51, %v3674_v50  ;;  %v6020_v55 = vpack.c.bf16 %v3677_v54, %v3676_v53  ;;  %v6031_v56 = vld [vmem:[%s7120_s3] ss:$0 sm:$0xff]  ;;  %vm6050_vm5 = vmpackc.low %vm742_vm2, %vm5706_vm4  ;;  %v3691_v37 = vld [vmem:[%s7123_s6 + $0x88] sm:$0xff] }
  0x6d   :  { %v6036_v58 = vld [vmem:[%s7121_s4] ss:$0 sm:$0xff]  ;;  %v6083_v38 = vld [vmem:[%s7122_s5 + $0x8] sm:$0xff]  ;;  %v3693_v42 = vld [vmem:[%s7123_s6 + $0x98] sm:$0xff] }
  0x6e   :  { %4993 = vmatpush3.bf16.msra.mxu0 %v4990_v6  ;;  %v6065_v33 = vld [vmem:[%s7122_s5] sm:$0xff]  ;;  %v6102_v43 = vld [vmem:[%s7122_s5 + $0x10] sm:$0xff]  ;;  %v3695_v47 = vld [vmem:[%s7123_s6 + $0xa8] sm:$0xff] }
  0x6f   :  { %v6121_v48 = vld [vmem:[%s7122_s5 + $0x18] sm:$0xff]  ;;  %v3696_v51 = vld [vmem:[%s7123_s6 + $0xb0] sm:$0xff]  ;;  %v6140_v54 = vld [vmem:[%s7122_s5 + $0x20] sm:$0x7] }
  0x70   :  { %v3697_v53 = vld [vmem:[%s7123_s6 + $0xb8] sm:$0xff] }
  0x71   :  { %4233 = vmatmul.mubr.msk.f32.vlgmr.msra.gmra.mrb[0].mxu0 %vm131_vm0, %v122_v10 }
  0x72   :  { %4235 = vmatprep.mubr.msk.f32.mxu0 %vm131_vm0, %v123_v11 }
  0x75   :  { %4236 = vmatmul.mubr.msk.f32.gmra.mrb[2].mxu0 %vm131_vm0, %v124_v12 }
  0x76   :  { %4238 = vmatprep.mubr.msk.f32.mxu0 %vm131_vm0, %v125_v13  ;;  %v7139_v13 = vmov 0.0|0.0  }
  0x77   :  { %5034 = vmatprep.subr.bf16.mxu0 %v7139_v13 }
  0x79   :  { %4239 = vmatmul.mubr.msk.f32.gmra.mrb[4].mxu0 %vm131_vm0, %v126_v14 }
  0x7a   :  { %4241 = vmatprep.mubr.msk.f32.mxu0 %vm131_vm0, %v127_v15  ;;  %v7137_v15 = vmov 0.0  }
  0x7d   :  { %4242 = vmatmul.mubr.msk.f32.gmra.mrb[6].mxu0 %vm131_vm0, %v128_v16 }
  0x7e   :  { %4244 = vmatprep.mubr.msk.f32.mxu0 %vm131_vm0, %v129_v17 }
  0x81   :  { %4245 = vmatmul.mubr.msk.f32.gmra.mrb[8].mxu0 %vm131_vm0, %v130_v18 }
  0x82   :  { %4306 = vmatprep.mubr.msk.f32.mxu0 %vm5702_vm3, %v7137_v15 }
 0x144   :  { %v4234_v25 = vpop.f32.mrb[0].mxu0 }
 0x145   :  { %v228_v26 = vpop.f32.mrb[1].mxu0 }
 0x148   :  { %v4237_v29 = vpop.f32.mrb[2].mxu0 }
 0x149   :  { %v238_v30 = vpop.f32.mrb[3].mxu0 }
 0x14a   :  { %4255 = vmatprep.mubr.msk.f32.mxu1 %vm131_vm0, %v238_v30  ;;  %v3689_v30 = vld [vmem:[%s7123_s6 + $0x78] sm:$0xff] }
 0x14b   :  { %4256 = vmatmul.mubr.msk.f32.vlgmr.msra.gmra.mrb[0].mxu1 %vm131_vm0, %v4237_v29  ;;  %v3688_v29 = vld [vmem:[%s7123_s6 + $0x70] sm:$0xff] }
 0x14c   :  { %5005 = vmatpush3.bf16.msra.mxu1 %v5944_v24  ;;  %4266 = vmatprep.mubr.msk.f32.mxu1 %vm131_vm0, %v228_v26  ;;  %v4240_v34 = vpop.f32.mrb[4].mxu0 }
 0x14d   :  { %5007 = vmatprep.subr.bf16.mxu1 %v5953_v31  ;;  %v248_v36 = vpop.f32.mrb[5].mxu0 }
 0x150   :  { %5009 = vmatpush3.bf16.msra.mxu1 %v5953_v31  ;;  %v4243_v39 = vpop.f32.mrb[6].mxu0 }
 0x151   :  { %5011 = vmatprep.subr.bf16.mxu1 %v5966_v35  ;;  %v258_v41 = vpop.f32.mrb[7].mxu0 }
 0x153   :  { %4267 = vmatmul.mubr.msk.f32.vlgmr.msra.gmra.mrb[0].mxu1 %vm131_vm0, %v4234_v25 }
 0x154   :  { %5013 = vmatpush3.bf16.msra.mxu1 %v5966_v35  ;;  %4277 = vmatprep.mubr.msk.f32.mxu1 %vm131_vm0, %v248_v36  ;;  %v4246_v44 = vpop.f32.mrb[8].mxu0  ;;  %v3690_v36 = vld [vmem:[%s7123_s6 + $0x80] sm:$0xff] }
 0x155   :  { %5015 = vmatprep.subr.bf16.mxu1 %v5976_v40  ;;  %v268_v46 = vpop.f32.mrb[9].mxu0 }
 0x158   :  { %5017 = vmatpush3.bf16.msra.mxu1 %v5976_v40 }
 0x159   :  { %5019 = vmatprep.subr.bf16.mxu1 %v5988_v45 }
 0x15b   :  { %4278 = vmatmul.mubr.msk.f32.vlgmr.msra.gmra.mrb[0].mxu1 %vm131_vm0, %v4240_v34  ;;  %v6067_v34 = vpack.c.bf16 %v3689_v30, %v3688_v29 }
 0x15c   :  { %5021 = vmatpush3.bf16.msra.mxu1 %v5988_v45  ;;  %4288 = vmatprep.mubr.msk.f32.mxu1 %vm131_vm0, %v258_v41  ;;  %v3692_v41 = vld [vmem:[%s7123_s6 + $0x90] sm:$0xff] }
 0x15d   :  { %5023 = vmatprep.subr.bf16.mxu1 %v5998_v49 }
 0x160   :  { %5025 = vmatpush3.bf16.msra.mxu1 %v5998_v49 }
 0x161   :  { %5027 = vmatprep.subr.bf16.mxu1 %v6010_v52 }
 0x163   :  { %4289 = vmatmul.mubr.msk.f32.vlgmr.msra.gmra.mrb[0].mxu1 %vm131_vm0, %v4243_v39  ;;  %v6086_v39 = vpack.c.bf16 %v3691_v37, %v3690_v36  ;;  %v888_v36 = vld [vmem:[%s7123_s6 + $0x30] sm:$0xff]  ;;  %v889_v37 = vld [vmem:[%s7123_s6 + $0x38] sm:$0xff] }
 0x164   :  { %5029 = vmatpush3.bf16.msra.mxu1 %v6010_v52  ;;  %4299 = vmatprep.mubr.msk.f32.mxu1 %vm131_vm0, %v268_v46  ;;  %v3694_v46 = vld [vmem:[%s7123_s6 + $0xa0] sm:$0xff] }
 0x165   :  { %5031 = vmatprep.subr.bf16.mxu1 %v6020_v55  ;;  %v6124_v50 = vpack.c.bf16 %v3695_v47, %v3694_v46  ;;  %v6220_v47 = vpack.c.bf16 %v889_v37, %v888_v36  ;;  %v3714_v36 = vld [vmem:[%s7123_s6 + $0x130] sm:$0xff]  ;;  %v3715_v37 = vld [vmem:[%s7123_s6 + $0x138] sm:$0xff] }
 0x168   :  { %5033 = vmatpush3.bf16.msra.mxu1 %v6020_v55 }
 0x16b   :  { %4300 = vmatmul.mubr.msk.f32.vlgmr.msra.gmra.mrb[0].mxu1 %vm131_vm0, %v4246_v44  ;;  %v6105_v44 = vpack.c.bf16 %v3693_v42, %v3692_v41 }
 0x23e   :  { %v4301_v57 = vpop.f32.mrb[0].mxu1 }
 0x23f   :  { %v720_v59 = vmul.f32 %v4301_v57, %v6031_v56  ;;  %v701_v60 = vpop.f32.mrb[1].mxu1  ;;  %v6143_v57 = vpack.c.bf16 %v3697_v53, %v3696_v51 }
 0x240   :  { %v719_v61 = vmul.f32 %v6031_v56, %v701_v60  ;;  %v3699_v60 = vld [vmem:[%s7123_s6 + $0xc8] sm:$0xff] }
 0x241   :  { %v729_v62 = vadd.f32 %v6036_v58, %v720_v59  ;;  %v3698_v59 = vld [vmem:[%s7123_s6 + $0xc0] sm:$0xff] }
 0x242   :  { %v728_v63 = vadd.f32 %v6036_v58, %v719_v61  ;;  %v6155_v61 = vpack.c.bf16 %v3699_v60, %v3698_v59  ;;  %v890_v59 = vld [vmem:[%s7123_s6 + $0x40] sm:$0xff]  ;;  %v891_v60 = vld [vmem:[%s7123_s6 + $0x48] sm:$0xff] }
 0x243   :  { %v731_v0 = vmax.f32 %v729_v62, 0.0  ;;  %v3700_v62 = vld [vmem:[%s7123_s6 + $0xd0] sm:$0xff] }
 0x244   :  { %v730_v1 = vmax.f32 %v728_v63, 0.0  ;;  %v3701_v63 = vld [vmem:[%s7123_s6 + $0xd8] sm:$0xff] }
 0x245   :  { %v736_v2 = vrot.slane %v731_v0, 1  ;;  %v744_v3 = vrot.slane %v731_v0, 2 }
 0x246   :  { %v735_v4 = vrot.slane %v730_v1, 1  ;;  %v743_v5 = vrot.slane %v730_v1, 2 }
 0x247   :  { %v741_v6 = vmax.f32 %v731_v0, %v736_v2  ;;  %v6168_v0 = vpack.c.bf16 %v3701_v63, %v3700_v62  ;;  %v6233_v63 = vpack.c.bf16 %v891_v60, %v890_v59  ;;  %v3719_v59 = vld [vmem:[%s7123_s6 + $0x150] sm:$0xff]  ;;  %v3720_v60 = vld [vmem:[%s7123_s6 + $0x158] sm:$0xff] }
 0x248   :  { %v737_v7 = vsel %vm734_vm1, %v735_v4, %v736_v2  ;;  %v745_v8 = vsel %vm742_vm2, %v743_v5, %v744_v3  ;;  %v883_v4 = vld [vmem:[%s7123_s6 + $0x8] sm:$0xff] }
 0x249   :  { %v740_v10 = vmax.f32 %v730_v1, %v737_v7  ;;  %v749_v12 = vmax.f32 %v741_v6, %v744_v3  ;;  %v882_v3 = vld [vmem:[%s7123_s6] sm:$0xff] }
 0x24b   :  { %v748_v11 = vmax.f32 %v740_v10, %v745_v8  ;;  %v6181_v8 = vpack.c.bf16 %v883_v4, %v882_v3  ;;  %v893_v3 = vld [vmem:[%s7123_s6 + $0x58] sm:$0xff] }
 0x24d   :  { %v5522_v14 = vpack.i.bf16 %v749_v12, %v748_v11 }
 0x24f   :  { %5523 = vrot.lane.b32.xlu0 %v5522_v14, %s5704_s26 }
 0x253   :  { %5528 = vrot.lane.b32.xlu0 %v5522_v14, %s5705_s28 }
 0x2c1   :  { %v5524_v16 = vpop.permute.xlu0 %5523 }
 0x2c2   :  { %v5526_v17 = vunpack.i.h.bf16 %v5524_v16  ;;  %v5525_v18 = vunpack.i.l.bf16 %v5524_v16 }
 0x2c4   :  { %v759_v20 = vmax.f32 %v749_v12, %v5526_v17  ;;  %v758_v22 = vmax.f32 %v748_v11, %v5525_v18  ;;  %v884_v11 = vld [vmem:[%s7123_s6 + $0x10] sm:$0xff]  ;;  %v885_v12 = vld [vmem:[%s7123_s6 + $0x18] sm:$0xff] }
 0x2c5   :  { %v5529_v19 = vpop.permute.xlu0 %5528  ;;  %v6192_v18 = vpack.c.bf16 %v885_v12, %v884_v11  ;;  %v3705_v11 = vld [vmem:[%s7123_s6 + $0xe8] sm:$0xff] }
 0x2c6   :  { %v5531_v23 = vunpack.i.h.bf16 %v5529_v19  ;;  %v5530_v25 = vunpack.i.l.bf16 %v5529_v19 }
 0x2c8   :  { %v766_v26 = vmax.f32 %v758_v22, %v5530_v25  ;;  %v767_v27 = vmax.f32 %v759_v20, %v5531_v23  ;;  %v886_v22 = vld [vmem:[%s7123_s6 + $0x20] sm:$0xff]  ;;  %v887_v23 = vld [vmem:[%s7123_s6 + $0x28] sm:$0xff] }
 0x2c9   :  { %v6207_v29 = vpack.c.bf16 %v887_v23, %v886_v22  ;;  %v3710_v22 = vld [vmem:[%s7123_s6 + $0x110] sm:$0xff]  ;;  %v3711_v23 = vld [vmem:[%s7123_s6 + $0x118] sm:$0xff] }
 0x2ca   :  { %v5035_v32 = vpack.c.bf16 %v767_v27, %v766_v26 }
 0x2cc   :  { %5037 = vmatpush3.bf16.msk.msra.mxu0 %vm6050_vm5, %v5035_v32 }
 0x2cd   :  { %5038 = vmatprep.subr.bf16.mxu0 %v7139_v13 }
 0x2cf   :  { %4307 = vmatmul.mubr.msk.f32.vlgmr.msra.gmra.mrb[10].mxu0 %vm773_vm6, %v6065_v33 }
 0x2d0   :  { %4309 = vmatprep.mubr.msk.f32.mxu0 %vm5702_vm3, %v7137_v15  ;;  %5040 = vmatpush3.bf16.msra.mxu0 %v6067_v34 }
 0x2d1   :  { %5041 = vmatprep.subr.bf16.mxu0 %v7139_v13 }
 0x2d3   :  { %4310 = vmatmul.mubr.msk.f32.gmra.mrb[12].mxu0 %vm773_vm6, %v6083_v38 }
 0x2d4   :  { %4312 = vmatprep.mubr.msk.f32.mxu0 %vm5702_vm3, %v7137_v15  ;;  %5043 = vmatpush3.bf16.msra.mxu0 %v6086_v39 }
 0x2d5   :  { %5044 = vmatprep.subr.bf16.mxu0 %v7139_v13 }
 0x2d7   :  { %4313 = vmatmul.mubr.msk.f32.gmra.mrb[14].mxu0 %vm773_vm6, %v6102_v43 }
 0x2d8   :  { %4315 = vmatprep.mubr.msk.f32.mxu0 %vm5702_vm3, %v7137_v15  ;;  %5046 = vmatpush3.bf16.msra.mxu0 %v6105_v44 }
 0x2d9   :  { %5047 = vmatprep.subr.bf16.mxu0 %v7139_v13 }
 0x2db   :  { %4316 = vmatmul.mubr.msk.f32.gmra.mrb[16].mxu0 %vm773_vm6, %v6121_v48 }
 0x2dc   :  { %4318 = vmatprep.mubr.msk.f32.mxu0 %vm5702_vm3, %v7137_v15  ;;  %5049 = vmatpush3.bf16.msra.mxu0 %v6124_v50 }
 0x2dd   :  { %5050 = vmatprep.subr.bf16.mxu0 %v7139_v13 }
 0x2df   :  { %4319 = vmatmul.mubr.msk.f32.gmra.mrb[18].mxu0 %vm773_vm6, %v6140_v54 }
 0x2e0   :  { %5052 = vmatpush3.bf16.msra.mxu0 %v6143_v57  ;;  %4349 = vmatprep.mubr.msk.f32.mxu0 %vm5702_vm3, %v7137_v15 }
 0x2e1   :  { %5053 = vmatprep.subr.bf16.mxu0 %v7139_v13 }
 0x2e4   :  { %5055 = vmatpush3.bf16.msra.mxu0 %v6155_v61 }
 0x2e5   :  { %5056 = vmatprep.subr.bf16.mxu0 %v7139_v13 }
 0x2e8   :  { %5058 = vmatpush3.bf16.msra.mxu0 %v6168_v0 }
 0x2e9   :  { %5059 = vmatprep.subr.bf16.mxu0 %v7139_v13 }
 0x3a2   :  { %v6172_v1 = vpop.f32.mrb[10].mxu0 }
 0x3a3   :  { %v4308_v2 = vpop.f32.mrb[11].mxu0  ;;  %v914_v6 = vrot.slane %v6172_v1, 7 }
 0x3a4   :  { %v892_v2 = vld [vmem:[%s7123_s6 + $0x50] sm:$0xff] }
 0x3a5   :  { %v6243_v4 = vpack.c.bf16 %v893_v3, %v892_v2  ;;  %v6337_v2 = vpack.c.bf16 %v3720_v60, %v3719_v59  ;;  %v3721_v3 = vld [vmem:[%s7123_s6 + $0x160] sm:$0xff]  ;;  %v3735_v60 = vld [vmem:[%s7123_s6 + $0x1c8] sm:$0xff] }
 0x3a6   :  { %v863_v5 = vpop.f32.mrb[12].mxu0  ;;  %v3734_v59 = vld [vmem:[%s7123_s6 + $0x1c0] sm:$0xff] }
 0x3a7   :  { %v915_v7 = vrot.slane %v863_v5, 7  ;;  %v4311_v10 = vpop.f32.mrb[13].mxu0  ;;  %v1079_v17 = vrot.slane %v863_v5, 6  ;;  %v894_v5 = vld [vmem:[%s7123_s6 + $0x60] sm:$0xff] }
 0x3a8   :  { %v3704_v10 = vld [vmem:[%s7123_s6 + $0xe0] sm:$0xff] }
 0x3a9   :  { %v916_v14 = vsel %vm913_vm7, %v914_v6, %v915_v7  ;;  %v895_v6 = vld [vmem:[%s7123_s6 + $0x68] sm:$0xff]  ;;  %v6263_v12 = vpack.c.bf16 %v3705_v11, %v3704_v10  ;;  %v3723_v10 = vld [vmem:[%s7123_s6 + $0x170] sm:$0xff]  ;;  %v3724_v11 = vld [vmem:[%s7123_s6 + $0x178] sm:$0xff] }
 0x3aa   :  { %4350 = vmatmul.mubr.msk.f32.vlgmr.msra.gmra.mrb[20].mxu0 %vm917_vm8, %v916_v14  ;;  %v868_v16 = vpop.f32.mrb[14].mxu0  ;;  %v6253_v7 = vpack.c.bf16 %v895_v6, %v894_v5  ;;  %v3706_v14 = vld [vmem:[%s7123_s6 + $0xf0] sm:$0xff]  ;;  %v3722_v5 = vld [vmem:[%s7123_s6 + $0x168] sm:$0xff] }
 0x3ab   :  { %5061 = vmatpush3.bf16.msra.mxu0 %v6181_v8  ;;  %v1080_v19 = vrot.slane %v868_v16, 6  ;;  %4380 = vmatprep.mubr.msk.f32.mxu0 %vm5702_vm3, %v7137_v15  ;;  %v4314_v20 = vpop.f32.mrb[15].mxu0  ;;  %v1172_v25 = vrot.slane %v868_v16, 5  ;;  %v3707_v16 = vld [vmem:[%s7123_s6 + $0xf8] sm:$0xff]  ;;  %v6349_v6 = vpack.c.bf16 %v3722_v5, %v3721_v3  ;;  %v6411_v3 = vpack.c.bf16 %v3735_v60, %v3734_v59  ;;  %v3736_v5 = vld [vmem:[%s7123_s6 + $0x1d0] sm:$0xff] }
 0x3ac   :  { %5062 = vmatprep.subr.bf16.mxu0 %v7139_v13  ;;  %v3709_v20 = vld [vmem:[%s7123_s6 + $0x108] sm:$0xff]  ;;  %v3744_v59 = vld [vmem:[%s7123_s6 + $0x210] sm:$0xff]  ;;  %v3745_v60 = vld [vmem:[%s7123_s6 + $0x218] sm:$0xff] }
 0x3ad   :  { %v6204_v26 = vsel %vm1078_vm9, %v1079_v17, %v1080_v19  ;;  %v6275_v17 = vpack.c.bf16 %v3707_v16, %v3706_v14  ;;  %v3708_v19 = vld [vmem:[%s7123_s6 + $0x100] sm:$0xff]  ;;  %v3726_v16 = vld [vmem:[%s7123_s6 + $0x188] sm:$0xff] }
 0x3ae   :  { %v873_v27 = vpop.f32.mrb[16].mxu0  ;;  %v3725_v14 = vld [vmem:[%s7123_s6 + $0x180] sm:$0xff] }
 0x3af   :  { %5064 = vmatpush3.bf16.msra.mxu0 %v6192_v18  ;;  %v1173_v30 = vrot.slane %v873_v27, 5  ;;  %v4317_v32 = vpop.f32.mrb[17].mxu0  ;;  %v1265_v41 = vrot.slane %v873_v27, 4  ;;  %v3712_v27 = vld [vmem:[%s7123_s6 + $0x120] sm:$0xff] }
 0x3b0   :  { %5065 = vmatprep.subr.bf16.mxu0 %v7139_v13 }
 0x3b1   :  { %v6217_v42 = vsel %vm1171_vm10, %v1172_v25, %v1173_v30  ;;  %v6297_v25 = vpack.c.bf16 %v3711_v23, %v3710_v22  ;;  %v3713_v30 = vld [vmem:[%s7123_s6 + $0x128] sm:$0xff]  ;;  %v3728_v22 = vld [vmem:[%s7123_s6 + $0x198] sm:$0xff] }
 0x3b2   :  { %v878_v46 = vpop.f32.mrb[18].mxu0  ;;  %v6307_v32 = vpack.c.bf16 %v3713_v30, %v3712_v27  ;;  %v3729_v27 = vld [vmem:[%s7123_s6 + $0x1a0] sm:$0xff]  ;;  %v3730_v30 = vld [vmem:[%s7123_s6 + $0x1a8] sm:$0xff] }
 0x3b3   :  { %5067 = vmatpush3.bf16.msra.mxu0 %v6207_v29  ;;  %v1266_v51 = vrot.slane %v878_v46, 4  ;;  %v4320_v53 = vpop.f32.mrb[19].mxu0  ;;  %v3716_v46 = vld [vmem:[%s7123_s6 + $0x140] sm:$0xff] }
 0x3b4   :  { %5068 = vmatprep.subr.bf16.mxu0 %v7139_v13 }
 0x3b5   :  { %v6230_v62 = vsel %vm1264_vm11, %v1265_v41, %v1266_v51  ;;  %v6317_v41 = vpack.c.bf16 %v3715_v37, %v3714_v36  ;;  %v3717_v51 = vld [vmem:[%s7123_s6 + $0x148] sm:$0xff]  ;;  %v6391_v36 = vpack.c.bf16 %v3730_v30, %v3729_v27  ;;  %v3731_v37 = vld [vmem:[%s7123_s6 + $0x1b0] sm:$0xff]  ;;  %v3742_v30 = vld [vmem:[%s7123_s6 + $0x200] sm:$0xff] }
 0x3b6   :  { %v6327_v53 = vpack.c.bf16 %v3717_v51, %v3716_v46  ;;  %v3732_v46 = vld [vmem:[%s7123_s6 + $0x1b8] sm:$0xff] }
 0x3b7   :  { %5070 = vmatpush3.bf16.msra.mxu0 %v6220_v47  ;;  %v6401_v51 = vpack.c.bf16 %v3732_v46, %v3731_v37  ;;  %v3743_v37 = vld [vmem:[%s7123_s6 + $0x208] sm:$0xff] }
 0x3b8   :  { %5071 = vmatprep.subr.bf16.mxu0 %v7139_v13  ;;  %v6455_v46 = vpack.c.bf16 %v3743_v37, %v3742_v30  ;;  %v6489_v30 = vld [vmem:[%s7125_s8] ss:$0 sm:$0xff]  ;;  %s5707_s8 = smov 96  }
 0x3b9   :  { %7182 = vst [vmem:[#allocation21_spill] sm:$0xff] %v6489_v30 }
 0x3ba   :  { %7178 = vst [vmem:[#allocation17_spill] sm:$0xff] %v6455_v46 }
 0x3bb   :  { %5073 = vmatpush3.bf16.msra.mxu0 %v6233_v63 }
 0x3bc   :  { %5074 = vmatprep.subr.bf16.mxu0 %v7139_v13 }
 0x3bf   :  { %5076 = vmatpush3.bf16.msra.mxu0 %v6243_v4 }
 0x3c0   :  { %5077 = vmatprep.subr.bf16.mxu0 %v7139_v13 }
 0x3c3   :  { %5079 = vmatpush3.bf16.msra.mxu0 %v6253_v7 }
 0x3c4   :  { %5080 = vmatprep.subr.bf16.mxu0 %v7139_v13 }
 0x3c6   :  { %4381 = vmatmul.mubr.msk.f32.vlgmr.msra.gmra.mrb[20].mxu0 %vm917_vm8, %v6172_v1  ;;  %v6287_v1 = vpack.c.bf16 %v3709_v20, %v3708_v19  ;;  %v6371_v19 = vpack.c.bf16 %v3726_v16, %v3725_v14  ;;  %v3727_v20 = vld [vmem:[%s7123_s6 + $0x190] sm:$0xff]  ;;  %v3738_v14 = vld [vmem:[%s7123_s6 + $0x1e0] sm:$0xff]  ;;  %v3739_v16 = vld [vmem:[%s7123_s6 + $0x1e8] sm:$0xff] }
 0x3c7   :  { %5082 = vmatpush3.bf16.msra.mxu0 %v6263_v12  ;;  %4411 = vmatprep.mubr.msk.f32.mxu0 %vm5702_vm3, %v7137_v15  ;;  %v6381_v23 = vpack.c.bf16 %v3728_v22, %v3727_v20  ;;  %v3740_v20 = vld [vmem:[%s7123_s6 + $0x1f0] sm:$0xff]  ;;  %v3741_v22 = vld [vmem:[%s7123_s6 + $0x1f8] sm:$0xff] }
 0x3c8   :  { %5083 = vmatprep.subr.bf16.mxu0 %v7139_v13  ;;  %v6445_v27 = vpack.c.bf16 %v3741_v22, %v3740_v20  ;;  %v6484_v20 = vld [vmem:[#allocation2] ss:$0 sm:$0xff] }
 0x3c9   :  { %7181 = vst [vmem:[#allocation20_spill] sm:$0xff] %v6484_v20 }
 0x3ca   :  { %7177 = vst [vmem:[#allocation16_spill] sm:$0xff] %v6445_v27 }
 0x3cb   :  { %5085 = vmatpush3.bf16.msra.mxu0 %v6275_v17 }
 0x3cc   :  { %5086 = vmatprep.subr.bf16.mxu0 %v7139_v13 }
 0x3cf   :  { %5088 = vmatpush3.bf16.msra.mxu0 %v6287_v1 }
 0x3d0   :  { %5089 = vmatprep.subr.bf16.mxu0 %v7139_v13 }
 0x3d3   :  { %5091 = vmatpush3.bf16.msra.mxu0 %v6297_v25 }
 0x3d4   :  { %5092 = vmatprep.subr.bf16.mxu0 %v7139_v13 }
 0x3d7   :  { %5094 = vmatpush3.bf16.msra.mxu0 %v6307_v32 }
 0x3d8   :  { %5095 = vmatprep.subr.bf16.mxu0 %v7139_v13 }
 0x3db   :  { %5097 = vmatpush3.bf16.msra.mxu0 %v6317_v41 }
 0x3dc   :  { %5098 = vmatprep.subr.bf16.mxu0 %v7139_v13 }
 0x3df   :  { %5100 = vmatpush3.bf16.msra.mxu0 %v6327_v53 }
 0x3e0   :  { %5101 = vmatprep.subr.bf16.mxu0 %v7139_v13 }
 0x3e2   :  { %4412 = vmatmul.mubr.msk.f32.vlgmr.msra.gmra.mrb[20].mxu0 %vm917_vm8, %v6204_v26  ;;  %v6361_v26 = vpack.c.bf16 %v3724_v11, %v3723_v10  ;;  %v3737_v10 = vld [vmem:[%s7123_s6 + $0x1d8] sm:$0xff] }
 0x3e3   :  { %5103 = vmatpush3.bf16.msra.mxu0 %v6337_v2  ;;  %4442 = vmatprep.mubr.msk.f32.mxu0 %vm5702_vm3, %v7137_v15  ;;  %v6423_v11 = vpack.c.bf16 %v3737_v10, %v3736_v5  ;;  %v6465_v5 = vpack.c.bf16 %v3745_v60, %v3744_v59  ;;  %v3746_v10 = vld [vmem:[%s7123_s6 + $0x220] sm:$0xff] }
 0x3e4   :  { %5104 = vmatprep.subr.bf16.mxu0 %v7139_v13 }
 0x3e5   :  { %7179 = vst [vmem:[#allocation18_spill] sm:$0xff] %v6465_v5 }
 0x3e7   :  { %5106 = vmatpush3.bf16.msra.mxu0 %v6349_v6 }
 0x3e8   :  { %5107 = vmatprep.subr.bf16.mxu0 %v7139_v13 }
 0x3eb   :  { %5109 = vmatpush3.bf16.msra.mxu0 %v6361_v26 }
 0x3ec   :  { %5110 = vmatprep.subr.bf16.mxu0 %v7139_v13 }
 0x3ef   :  { %5112 = vmatpush3.bf16.msra.mxu0 %v6371_v19 }
 0x3f0   :  { %5113 = vmatprep.subr.bf16.mxu0 %v7139_v13 }
 0x3f3   :  { %5115 = vmatpush3.bf16.msra.mxu0 %v6381_v23 }
 0x3f4   :  { %5116 = vmatprep.subr.bf16.mxu0 %v7139_v13 }
 0x3f7   :  { %5118 = vmatpush3.bf16.msra.mxu0 %v6391_v36 }
 0x3f8   :  { %5119 = vmatprep.subr.bf16.mxu0 %v7139_v13 }
 0x3fb   :  { %5121 = vmatpush3.bf16.msra.mxu0 %v6401_v51 }
 0x3fc   :  { %5122 = vmatprep.subr.bf16.mxu0 %v7139_v13 }
 0x3fe   :  { %4443 = vmatmul.mubr.msk.f32.vlgmr.msra.gmra.mrb[20].mxu0 %vm917_vm8, %v6217_v42  ;;  %v6435_v42 = vpack.c.bf16 %v3739_v16, %v3738_v14  ;;  %v3747_v14 = vld [vmem:[%s7123_s6 + $0x228] sm:$0xff] }
 0x3ff   :  { %5124 = vmatpush3.bf16.msra.mxu0 %v6411_v3  ;;  %4473 = vmatprep.mubr.msk.f32.mxu0 %vm5702_vm3, %v7137_v15  ;;  %v6475_v16 = vpack.c.bf16 %v3747_v14, %v3746_v10 }
 0x400   :  { %5125 = vmatprep.subr.bf16.mxu0 %v7139_v13 }
 0x401   :  { %7180 = vst [vmem:[#allocation19_spill] sm:$0xff] %v6475_v16 }
 0x403   :  { %5127 = vmatpush3.bf16.msra.mxu0 %v6423_v11 }
 0x404   :  { %5128 = vmatprep.subr.bf16.mxu0 %v7139_v13 }
 0x407   :  { %5130 = vmatpush3.bf16.msra.mxu0 %v6435_v42 }
 0x408   :  { %5131 = vmatprep.subr.bf16.mxu0 %v7139_v13 }
 0x40b   :  { %5133 = vmatpush3.bf16.msra.mxu0 %v6445_v27 }
 0x40c   :  { %5134 = vmatprep.subr.bf16.mxu0 %v7139_v13 }
 0x40f   :  { %5136 = vmatpush3.bf16.msra.mxu0 %v6455_v46 }
 0x410   :  { %5137 = vmatprep.subr.bf16.mxu0 %v7139_v13 }
 0x413   :  { %5139 = vmatpush3.bf16.msra.mxu0 %v6465_v5  ;;  %v1465_v5 = vld [vmem:[%s7127_s10 + $0x18] sm:$0xff] }
 0x414   :  { %5140 = vmatprep.subr.bf16.mxu0 %v7139_v13 }
 0x417   :  { %5142 = vmatpush3.bf16.msra.mxu0 %v6475_v16 }
 0x418   :  { %5266 = vmatprep.subr.bf16.mxu0 %v7139_v13 }
 0x41a   :  { %4474 = vmatmul.mubr.msk.f32.vlgmr.msra.gmra.mrb[20].mxu0 %vm917_vm8, %v6230_v62  ;;  %v6496_v62 = vld [vmem:[%s7126_s9] sm:$0xff] }
 0x41b   :  { %4678 = vmatprep.mubr.msk.f32.mxu0 %vm5702_vm3, %v7137_v15  ;;  %4478 = vmatprep.mubr.msk.f32.mxu1 %vm1376_vm12, %v6496_v62 }
 0x4ed   :  { %v1336_v22 = vpop.f32.mrb[20].mxu0 }
 0x4ee   :  { %v1348_v37 = vmul.f32 %v6484_v20, %v1336_v22  ;;  %v4475_v59 = vpop.f32.mrb[21].mxu0  ;;  %v1464_v20 = vld [vmem:[%s7127_s10 + $0x10] sm:$0xff] }
 0x4ef   :  { %v3754_v59 = vld [vmem:[%s7127_s10 + $0x50] sm:$0xff]  ;;  %v6584_v27 = vpack.c.bf16 %v1465_v5, %v1464_v20  ;;  %v1469_v20 = vld [vmem:[%s7127_s10 + $0x38] sm:$0xff] }
 0x4f0   :  { %v1356_v60 = vadd.f32 %v6489_v30, %v1348_v37  ;;  %v1468_v5 = vld [vmem:[%s7127_s10 + $0x30] sm:$0xff] }
 0x4f1   :  { %7192 = vst [vmem:[#allocation29_spill] sm:$0xff] %v6584_v27 }
 0x4f2   :  { %v1357_v10 = vmax.f32 %v1356_v60, 0.0  ;;  %v3755_v60 = vld [vmem:[%s7127_s10 + $0x58] sm:$0xff] }
 0x4f4   :  { %v1359_v14 = vrot.slane %v1357_v10, 1  ;;  %v1362_v13 = vrot.slane %v1357_v10, 2 }
 0x4f6   :  { %v1361_v15 = vmax.f32 %v1357_v10, %v1359_v14  ;;  %v3757_v10 = vld [vmem:[%s7127_s10 + $0x68] sm:$0xff] }
 0x4f8   :  { %v1364_v16 = vmax.f32 %v1361_v15, %v1362_v13  ;;  %v6511_v13 = vld [vmem:[%s7126_s9 + $0x8] sm:$0x7f]  ;;  %v6513_v15 = vpack.c.bf16 %v3755_v60, %v3754_v59  ;;  %v3758_v59 = vld [vmem:[%s7127_s10 + $0x70] sm:$0xff]  ;;  %v3759_v60 = vld [vmem:[%s7127_s10 + $0x78] sm:$0xff] }
 0x4f9   :  { %7183 = vst [vmem:[#allocation22_spill] sm:$0xff] %v6511_v13 }
 0x4fa   :  { %1366 = vrot.lane.b32.xlu1 %v1364_v16, %s5705_s28  ;;  %7184 = vst [vmem:[#allocation23_spill] sm:$0xff] %v6513_v15 }
 0x4fe   :  { %1370 = vrot.lane.b32.xlu1 %v1364_v16, %s5707_s8 }
 0x56c   :  { %v1367_v22 = vpop.permute.xlu1 %1366 }
 0x56d   :  { %v1369_v37 = vmax.f32 %v1364_v16, %v1367_v22  ;;  %v3756_v16 = vld [vmem:[%s7127_s10 + $0x60] sm:$0xff] }
 0x56e   :  { %v6527_v22 = vpack.c.bf16 %v3757_v10, %v3756_v16  ;;  %v3760_v16 = vld [vmem:[%s7127_s10 + $0x80] sm:$0xff]  ;;  %v3761_v10 = vld [vmem:[%s7127_s10 + $0x88] sm:$0xff] }
 0x570   :  { %v1371_v30 = vpop.permute.xlu1 %1370  ;;  %7186 = vst [vmem:[#allocation24_spill] sm:$0xff] %v6527_v22 }
 0x571   :  { %v1373_v14 = vmax.f32 %v1369_v37, %v1371_v30  ;;  %v7185_v30 = vmov 0.0|0.0   ;;  %v7187_v37 = vmov 0.0  }
 0x573   :  { %4476 = vmatprep.subr.msk.mxu1 %vm1383_vm13, %v1373_v14 }
 0x574   :  { %4477 = vmatpush3.msk.msra.mxu1 %vm1383_vm13, %v1373_v14  ;;  %v6539_v14 = vpack.c.bf16 %v3759_v60, %v3758_v59  ;;  %v3762_v59 = vld [vmem:[%s7127_s10 + $0x90] sm:$0xff]  ;;  %v3763_v60 = vld [vmem:[%s7127_s10 + $0x98] sm:$0xff] }
 0x575   :  { %4479 = vmatmul.mubr.msk.f32.vlgmr.msra.gmra.mrb[2].mxu1 %vm1376_vm12, %v6511_v13  ;;  %5143 = vmatprep.subr.bf16.mxu1 %v7185_v30 }
 0x576   :  { %5145 = vmatpush3.bf16.msra.mxu1 %v6513_v15  ;;  %4501 = vmatprep.mubr.msk.f32.mxu1 %vm5702_vm3, %v7187_v37  ;;  %7188 = vst [vmem:[#allocation25_spill] sm:$0xff] %v6539_v14  ;;  %v6549_v15 = vpack.c.bf16 %v3761_v10, %v3760_v16  ;;  %v1462_v16 = vld [vmem:[%s7127_s10] sm:$0xff]  ;;  %v1463_v10 = vld [vmem:[%s7127_s10 + $0x8] sm:$0xff] }
 0x577   :  { %5146 = vmatprep.subr.bf16.mxu1 %v7185_v30 }
 0x578   :  { %7189 = vst [vmem:[#allocation26_spill] sm:$0xff] %v6549_v15 }
 0x57a   :  { %5148 = vmatpush3.bf16.msra.mxu1 %v6527_v22  ;;  %v6560_v22 = vpack.c.bf16 %v3763_v60, %v3762_v59  ;;  %v6573_v59 = vpack.c.bf16 %v1463_v10, %v1462_v16  ;;  %v1466_v16 = vld [vmem:[%s7127_s10 + $0x20] sm:$0xff]  ;;  %v1467_v10 = vld [vmem:[%s7127_s10 + $0x28] sm:$0xff] }
 0x57b   :  { %5149 = vmatprep.subr.bf16.mxu1 %v7185_v30 }
 0x57c   :  { %7190 = vst [vmem:[#allocation27_spill] sm:$0xff] %v6560_v22  ;;  %7191 = vst [vmem:[#allocation28_spill] sm:$0xff] %v6573_v59 }
 0x57e   :  { %5151 = vmatpush3.bf16.msra.mxu1 %v6539_v14 }
 0x57f   :  { %5152 = vmatprep.subr.bf16.mxu1 %v7185_v30 }
 0x582   :  { %5154 = vmatpush3.bf16.msra.mxu1 %v6549_v15 }
 0x583   :  { %5155 = vmatprep.subr.bf16.mxu1 %v7185_v30 }
 0x586   :  { %5157 = vmatpush3.bf16.msra.mxu1 %v6560_v22 }
 0x587   :  { %5158 = vmatprep.subr.bf16.mxu1 %v7185_v30 }
 0x648   :  { %v6570_v15 = vpop.f32.mrb[2].mxu1 }
 0x649   :  { %v1643_v14 = vrot.slane %v6570_v15, 6  ;;  %v1453_v13 = vpop.f32.mrb[3].mxu1 }
 0x64a   :  { %v1484_v60 = vrot.slane %v1453_v13, 3  ;;  %v1642_v22 = vrot.slane %v1453_v13, 6 }
 0x64c   :  { %4502 = vmatmul.mubr.msk.f32.vlgmr.msra.gmra.mrb[4].mxu1 %vm1485_vm14, %v1484_v60  ;;  %v1644_v46 = vsel %vm1078_vm9, %v1642_v22, %v1643_v14  ;;  %v6596_v22 = vpack.c.bf16 %v1467_v10, %v1466_v16  ;;  %v6606_v14 = vpack.c.bf16 %v1469_v20, %v1468_v5  ;;  %v1470_v60 = vld [vmem:[%s7127_s10 + $0x40] sm:$0xff]  ;;  %v1471_v16 = vld [vmem:[%s7127_s10 + $0x48] sm:$0xff] }
 0x64d   :  { %5160 = vmatpush3.bf16.msra.mxu1 %v6573_v59  ;;  %4524 = vmatprep.mubr.msk.f32.mxu1 %vm5702_vm3, %v7187_v37  ;;  %v6616_v10 = vpack.c.bf16 %v1471_v16, %v1470_v60  ;;  %v3766_v5 = vld [vmem:[%s7127_s10 + $0xa0] sm:$0xff]  ;;  %v3767_v20 = vld [vmem:[%s7127_s10 + $0xa8] sm:$0xff]  ;;  %v3768_v60 = vld [vmem:[%s7127_s10 + $0xb0] sm:$0xff] }
 0x64e   :  { %5161 = vmatprep.subr.bf16.mxu1 %v7185_v30  ;;  %7193 = vst [vmem:[#allocation30_spill] sm:$0xff] %v6596_v22  ;;  %7194 = vst [vmem:[#allocation31_spill] sm:$0xff] %v6606_v14  ;;  %v3769_v16 = vld [vmem:[%s7127_s10 + $0xb8] sm:$0xff] }
 0x64f   :  { %7195 = vst [vmem:[#allocation32_spill] sm:$0xff] %v6616_v10 }
 0x651   :  { %5163 = vmatpush3.bf16.msra.mxu1 %v6584_v27  ;;  %v1814_v27 = vrot.slane %v6570_v15, 4 }
 0x652   :  { %5164 = vmatprep.subr.bf16.mxu1 %v7185_v30 }
 0x655   :  { %5166 = vmatpush3.bf16.msra.mxu1 %v6596_v22  ;;  %v6626_v22 = vpack.c.bf16 %v3767_v20, %v3766_v5  ;;  %v3770_v5 = vld [vmem:[%s7127_s10 + $0xc0] sm:$0xff]  ;;  %v3771_v20 = vld [vmem:[%s7127_s10 + $0xc8] sm:$0xff] }
 0x656   :  { %5167 = vmatprep.subr.bf16.mxu1 %v7185_v30 }
 0x657   :  { %7196 = vst [vmem:[#allocation33_spill] sm:$0xff] %v6626_v22 }
 0x659   :  { %5169 = vmatpush3.bf16.msra.mxu1 %v6606_v14  ;;  %v6637_v14 = vpack.c.bf16 %v3769_v16, %v3768_v60  ;;  %v3772_v60 = vld [vmem:[%s7127_s10 + $0xd0] sm:$0xff]  ;;  %v3773_v16 = vld [vmem:[%s7127_s10 + $0xd8] sm:$0xff] }
 0x65a   :  { %5170 = vmatprep.subr.bf16.mxu1 %v7185_v30 }
 0x65b   :  { %7197 = vst [vmem:[#allocation34_spill] sm:$0xff] %v6637_v14 }
 0x65d   :  { %5172 = vmatpush3.bf16.msra.mxu1 %v6616_v10  ;;  %v3804_v10 = vld [vmem:[%s7173_s7 + $0x38] sm:$0xff] }
 0x65e   :  { %5173 = vmatprep.subr.bf16.mxu1 %v7185_v30 }
 0x660   :  { %4525 = vmatmul.mubr.msk.f32.vlgmr.msra.gmra.mrb[4].mxu1 %vm1485_vm14, %v1453_v13  ;;  %v6649_v13 = vpack.c.bf16 %v3771_v20, %v3770_v5  ;;  %v3774_v5 = vld [vmem:[%s7127_s10 + $0xe0] sm:$0xff]  ;;  %v3775_v20 = vld [vmem:[%s7127_s10 + $0xe8] sm:$0xff] }
 0x661   :  { %5175 = vmatpush3.bf16.msra.mxu1 %v6626_v22  ;;  %4547 = vmatprep.mubr.msk.f32.mxu1 %vm5702_vm3, %v7187_v37  ;;  %v6659_v22 = vpack.c.bf16 %v3773_v16, %v3772_v60  ;;  %v3777_v60 = vld [vmem:[%s7127_s10 + $0xf0] sm:$0xff]  ;;  %v3778_v16 = vld [vmem:[%s7127_s10 + $0xf8] sm:$0xff] }
 0x662   :  { %5176 = vmatprep.subr.bf16.mxu1 %v7185_v30  ;;  %7198 = vst [vmem:[#allocation35_spill] sm:$0xff] %v6649_v13 }
 0x663   :  { %7199 = vst [vmem:[#allocation36_spill] sm:$0xff] %v6659_v22 }
 0x665   :  { %5178 = vmatpush3.bf16.msra.mxu1 %v6637_v14  ;;  %v6669_v14 = vpack.c.bf16 %v3775_v20, %v3774_v5  ;;  %v3779_v5 = vld [vmem:[%s7127_s10 + $0x100] sm:$0xff]  ;;  %v3780_v20 = vld [vmem:[%s7127_s10 + $0x108] sm:$0xff] }
 0x666   :  { %5179 = vmatprep.subr.bf16.mxu1 %v7185_v30 }
 0x667   :  { %7200 = vst [vmem:[#allocation37_spill] sm:$0xff] %v6669_v14 }
 0x669   :  { %5181 = vmatpush3.bf16.msra.mxu1 %v6649_v13  ;;  %v6679_v13 = vpack.c.bf16 %v3778_v16, %v3777_v60  ;;  %v3781_v60 = vld [vmem:[%s7127_s10 + $0x110] sm:$0xff]  ;;  %v3782_v16 = vld [vmem:[%s7127_s10 + $0x118] sm:$0xff] }
 0x66a   :  { %5182 = vmatprep.subr.bf16.mxu1 %v7185_v30 }
 0x66b   :  { %7201 = vst [vmem:[#allocation38_spill] sm:$0xff] %v6679_v13 }
 0x66d   :  { %5184 = vmatpush3.bf16.msra.mxu1 %v6659_v22  ;;  %v6690_v22 = vpack.c.bf16 %v3780_v20, %v3779_v5  ;;  %v3783_v5 = vld [vmem:[%s7127_s10 + $0x120] sm:$0xff]  ;;  %v3784_v20 = vld [vmem:[%s7127_s10 + $0x128] sm:$0xff] }
 0x66e   :  { %5185 = vmatprep.subr.bf16.mxu1 %v7185_v30 }
 0x66f   :  { %7202 = vst [vmem:[#allocation39_spill] sm:$0xff] %v6690_v22 }
 0x671   :  { %5187 = vmatpush3.bf16.msra.mxu1 %v6669_v14  ;;  %v1729_v14 = vrot.slane %v6570_v15, 1  ;;  %v5545_v15 = vld [vmem:[%s7174_s1 + $0x18] sm:$0xff] }
 0x672   :  { %5188 = vmatprep.subr.bf16.mxu1 %v7185_v30 }
 0x674   :  { %4548 = vmatmul.mubr.msk.f32.vlgmr.msra.gmra.mrb[4].mxu1 %vm1485_vm14, %v1644_v46  ;;  %v6702_v46 = vpack.c.bf16 %v3782_v16, %v3781_v60  ;;  %v3785_v60 = vld [vmem:[%s7127_s10 + $0x130] sm:$0xff]  ;;  %v3786_v16 = vld [vmem:[%s7127_s10 + $0x138] sm:$0xff] }
 0x675   :  { %5190 = vmatpush3.bf16.msra.mxu1 %v6679_v13  ;;  %4570 = vmatprep.mubr.msk.f32.mxu1 %vm5702_vm3, %v7187_v37  ;;  %v6712_v13 = vpack.c.bf16 %v3784_v20, %v3783_v5  ;;  %v3788_v5 = vld [vmem:[%s7127_s10 + $0x140] sm:$0xff]  ;;  %v3789_v20 = vld [vmem:[%s7127_s10 + $0x148] sm:$0xff] }
 0x676   :  { %5191 = vmatprep.subr.bf16.mxu1 %v7185_v30  ;;  %7203 = vst [vmem:[#allocation40_spill] sm:$0xff] %v6702_v46 }
 0x677   :  { %7204 = vst [vmem:[#allocation41_spill] sm:$0xff] %v6712_v13 }
 0x679   :  { %5193 = vmatpush3.bf16.msra.mxu1 %v6690_v22  ;;  %v6722_v22 = vpack.c.bf16 %v3786_v16, %v3785_v60  ;;  %v3790_v60 = vld [vmem:[%s7127_s10 + $0x150] sm:$0xff]  ;;  %v3791_v16 = vld [vmem:[%s7127_s10 + $0x158] sm:$0xff] }
 0x67a   :  { %5194 = vmatprep.subr.bf16.mxu1 %v7185_v30 }
 0x67b   :  { %7205 = vst [vmem:[#allocation42_spill] sm:$0xff] %v6722_v22 }
 0x67d   :  { %5196 = vmatpush3.bf16.msra.mxu1 %v6702_v46  ;;  %v6732_v46 = vpack.c.bf16 %v3789_v20, %v3788_v5  ;;  %v3792_v5 = vld [vmem:[%s7127_s10 + $0x160] sm:$0xff]  ;;  %v3793_v20 = vld [vmem:[%s7127_s10 + $0x168] sm:$0xff] }
 0x67e   :  { %5197 = vmatprep.subr.bf16.mxu1 %v7185_v30 }
 0x67f   :  { %7206 = vst [vmem:[#allocation43_spill] sm:$0xff] %v6732_v46 }
 0x681   :  { %5199 = vmatpush3.bf16.msra.mxu1 %v6712_v13  ;;  %v6744_v13 = vpack.c.bf16 %v3791_v16, %v3790_v60  ;;  %v3794_v60 = vld [vmem:[%s7127_s10 + $0x170] sm:$0xff]  ;;  %v3795_v16 = vld [vmem:[%s7127_s10 + $0x178] sm:$0xff] }
 0x682   :  { %5200 = vmatprep.subr.bf16.mxu1 %v7185_v30 }
 0x683   :  { %7207 = vst [vmem:[#allocation44_spill] sm:$0xff] %v6744_v13 }
 0x685   :  { %5202 = vmatpush3.bf16.msra.mxu1 %v6722_v22  ;;  %v3803_v22 = vld [vmem:[%s7173_s7 + $0x30] sm:$0xff] }
 0x686   :  { %5203 = vmatprep.subr.bf16.mxu1 %v7185_v30  ;;  %v5222_v59 = vpack.c.bf16 %v3804_v10, %v3803_v22  ;;  %v5548_v22 = vld [vmem:[%s7174_s1 + $0x30] sm:$0xff]  ;;  %v5549_v10 = vld [vmem:[%s7174_s1 + $0x38] sm:$0xff] }
 0x688   :  { %4571 = vmatmul.mubr.msk.f32.vlgmr.msra.gmra.mrb[4].mxu1 %vm1485_vm14, %v1729_v14  ;;  %v6756_v14 = vpack.c.bf16 %v3793_v20, %v3792_v5  ;;  %v3796_v5 = vld [vmem:[%s7127_s10 + $0x180] sm:$0xff]  ;;  %v3797_v20 = vld [vmem:[%s7127_s10 + $0x188] sm:$0xff] }
 0x689   :  { %5205 = vmatpush3.bf16.msra.mxu1 %v6732_v46  ;;  %4593 = vmatprep.mubr.msk.f32.mxu1 %vm5702_vm3, %v7187_v37  ;;  %v6766_v46 = vpack.c.bf16 %v3795_v16, %v3794_v60  ;;  %v6782_v60 = vpack.c.bf16 %v3797_v20, %v3796_v5  ;;  %v5551_v5 = vld [vmem:[%s7174_s1 + $0x48] sm:$0xff] }
 0x68a   :  { %5206 = vmatprep.subr.bf16.mxu1 %v7185_v30  ;;  %7208 = vst [vmem:[#allocation45_spill] sm:$0xff] %v6756_v14 }
 0x68d   :  { %5208 = vmatpush3.bf16.msra.mxu1 %v6744_v13  ;;  %v3801_v13 = vld [vmem:[%s7173_s7 + $0x20] sm:$0xff] }
 0x68e   :  { %5209 = vmatprep.subr.bf16.mxu1 %v7185_v30 }
 0x691   :  { %5211 = vmatpush3.bf16.msra.mxu1 %v6756_v14  ;;  %v3802_v14 = vld [vmem:[%s7173_s7 + $0x28] sm:$0xff] }
 0x692   :  { %5212 = vmatprep.subr.bf16.mxu1 %v7185_v30  ;;  %v5218_v16 = vpack.c.bf16 %v3802_v14, %v3801_v13  ;;  %v5542_v13 = vld [vmem:[%s7174_s1] sm:$0xff]  ;;  %v5543_v14 = vld [vmem:[%s7174_s1 + $0x8] sm:$0xff] }
 0x695   :  { %5214 = vmatpush3.bf16.msra.mxu1 %v6766_v46 }
 0x696   :  { %5215 = vmatprep.subr.bf16.mxu1 %v7185_v30 }
 0x699   :  { %5217 = vmatpush3.bf16.msra.mxu1 %v6782_v60 }
 0x69a   :  { %5219 = vmatprep.subr.bf16.mxu1 %v5218_v16 }
 0x69c   :  { %4594 = vmatmul.mubr.msk.f32.vlgmr.msra.gmra.mrb[4].mxu1 %vm1485_vm14, %v1814_v27  ;;  %v5544_v27 = vld [vmem:[%s7174_s1 + $0x10] sm:$0xff] }
 0x69d   :  { %5221 = vmatpush3.bf16.msra.mxu1 %v5218_v16  ;;  %4604 = vmatprep.mubr.msk.f32.mxu1 %vm131_vm0, %v5542_v13 }
 0x69e   :  { %5223 = vmatprep.subr.bf16.mxu1 %v5222_v59 }
 0x6a1   :  { %5225 = vmatpush3.bf16.msra.mxu1 %v5222_v59  ;;  %v5546_v59 = vld [vmem:[%s7174_s1 + $0x20] sm:$0xff] }
 0x6a2   :  { %5227 = vmatprep.subr.bf16.mxu1 %v5888_v9 }
 0x6a4   :  { %4605 = vmatmul.mubr.msk.f32.vlgmr.msra.gmra.mrb[6].mxu1 %vm131_vm0, %v5543_v14 }
 0x6a5   :  { %4607 = vmatprep.mubr.msk.f32.mxu1 %vm131_vm0, %v5544_v27  ;;  %5229 = vmatpush3.bf16.msra.mxu1 %v5888_v9  ;;  %v5547_v9 = vld [vmem:[%s7174_s1 + $0x28] sm:$0xff] }
 0x6a6   :  { %5231 = vmatprep.subr.bf16.mxu1 %v5934_v21 }
 0x6a8   :  { %4608 = vmatmul.mubr.msk.f32.gmra.mrb[8].mxu1 %vm131_vm0, %v5545_v15 }
 0x6a9   :  { %4610 = vmatprep.mubr.msk.f32.mxu1 %vm131_vm0, %v5546_v59  ;;  %5233 = vmatpush3.bf16.msra.mxu1 %v5934_v21  ;;  %v5550_v21 = vld [vmem:[%s7174_s1 + $0x40] sm:$0xff] }
 0x6aa   :  { %5235 = vmatprep.subr.bf16.mxu1 %v5944_v24 }
 0x6ac   :  { %4611 = vmatmul.mubr.msk.f32.gmra.mrb[10].mxu1 %vm131_vm0, %v5547_v9 }
 0x6ad   :  { %4613 = vmatprep.mubr.msk.f32.mxu1 %vm131_vm0, %v5548_v22 }
 0x6b0   :  { %4614 = vmatmul.mubr.msk.f32.gmra.mrb[12].mxu1 %vm131_vm0, %v5549_v10 }
 0x6b1   :  { %4616 = vmatprep.mubr.msk.f32.mxu1 %vm131_vm0, %v5550_v21 }
 0x6b4   :  { %4617 = vmatmul.mubr.msk.f32.gmra.mrb[14].mxu1 %vm131_vm0, %v5551_v5 }
 0x76f   :  { %v6839_v20 = vpop.f32.mrb[4].mxu1 }
 0x770   :  { %v4595_v16 = vpop.f32.mrb[5].mxu1 }
 0x777   :  { %v4606_v13 = vpop.f32.mrb[6].mxu1 }
 0x778   :  { %v1992_v14 = vpop.f32.mrb[7].mxu1 }
 0x77b   :  { %v4609_v27 = vpop.f32.mrb[8].mxu1 }
 0x77c   :  { %v2002_v15 = vpop.f32.mrb[9].mxu1 }
 0x77d   :  { %4627 = vmatprep.mubr.msk.f32.mxu1 %vm131_vm0, %v2002_v15 }
 0x77e   :  { %4628 = vmatmul.mubr.msk.f32.vlgmr.msra.gmra.mrb[16].mxu1 %vm131_vm0, %v4609_v27 }
 0x77f   :  { %5237 = vmatpush3.bf16.msra.mxu1 %v5944_v24  ;;  %4638 = vmatprep.mubr.msk.f32.mxu1 %vm131_vm0, %v1992_v14  ;;  %v4612_v59 = vpop.f32.mrb[10].mxu1 }
 0x780   :  { %5239 = vmatprep.subr.bf16.mxu1 %v5953_v31  ;;  %v2012_v9 = vpop.f32.mrb[11].mxu1 }
 0x783   :  { %5241 = vmatpush3.bf16.msra.mxu1 %v5953_v31  ;;  %v4615_v22 = vpop.f32.mrb[12].mxu1 }
 0x784   :  { %5243 = vmatprep.subr.bf16.mxu1 %v5966_v35  ;;  %v2022_v10 = vpop.f32.mrb[13].mxu1 }
 0x786   :  { %4639 = vmatmul.mubr.msk.f32.vlgmr.msra.gmra.mrb[16].mxu1 %vm131_vm0, %v4606_v13 }
 0x787   :  { %5245 = vmatpush3.bf16.msra.mxu1 %v5966_v35  ;;  %4649 = vmatprep.mubr.msk.f32.mxu1 %vm131_vm0, %v2012_v9  ;;  %v4618_v21 = vpop.f32.mrb[14].mxu1 }
 0x788   :  { %5247 = vmatprep.subr.bf16.mxu1 %v5976_v40  ;;  %v2032_v24 = vpop.f32.mrb[15].mxu1 }
 0x78b   :  { %5249 = vmatpush3.bf16.msra.mxu1 %v5976_v40 }
 0x78c   :  { %5251 = vmatprep.subr.bf16.mxu1 %v5988_v45 }
 0x78e   :  { %4650 = vmatmul.mubr.msk.f32.vlgmr.msra.gmra.mrb[16].mxu1 %vm131_vm0, %v4612_v59 }
 0x78f   :  { %5253 = vmatpush3.bf16.msra.mxu1 %v5988_v45  ;;  %4660 = vmatprep.mubr.msk.f32.mxu1 %vm131_vm0, %v2022_v10  ;;  %v5552_v45 = vld [vmem:[%s7120_s3] ss:$0 sm:$0xff] }
 0x790   :  { %5255 = vmatprep.subr.bf16.mxu1 %v5998_v49 }
 0x793   :  { %5257 = vmatpush3.bf16.msra.mxu1 %v5998_v49 }
 0x794   :  { %5259 = vmatprep.subr.bf16.mxu1 %v6010_v52 }
 0x796   :  { %4661 = vmatmul.mubr.msk.f32.vlgmr.msra.gmra.mrb[16].mxu1 %vm131_vm0, %v4615_v22 }
 0x797   :  { %5261 = vmatpush3.bf16.msra.mxu1 %v6010_v52  ;;  %4671 = vmatprep.mubr.msk.f32.mxu1 %vm131_vm0, %v2032_v24 }
 0x798   :  { %5263 = vmatprep.subr.bf16.mxu1 %v6020_v55 }
 0x79b   :  { %5265 = vmatpush3.bf16.msra.mxu1 %v6020_v55  ;;  %v5553_v55 = vld [vmem:[%s7121_s4] ss:$0 sm:$0xff] }
 0x79e   :  { %4672 = vmatmul.mubr.msk.f32.vlgmr.msra.gmra.mrb[16].mxu1 %vm131_vm0, %v4618_v21 }
 0x79f   :  { %4850 = vmatprep.mubr.msk.f32.mxu1 %vm1376_vm12, %v6496_v62 }
 0x871   :  { %v4673_v31 = vpop.f32.mrb[16].mxu1 }
 0x872   :  { %v2453_v35 = vmul.f32 %v4673_v31, %v6031_v56  ;;  %v2441_v40 = vpop.f32.mrb[17].mxu1 }
 0x873   :  { %v2452_v49 = vmul.f32 %v5552_v45, %v2441_v40 }
 0x874   :  { %v2455_v52 = vadd.f32 %v6036_v58, %v2453_v35 }
 0x875   :  { %v2454_v5 = vadd.f32 %v5553_v55, %v2452_v49 }
 0x876   :  { %v2457_v16 = vmax.f32 %v2455_v52, 0.0 }
 0x877   :  { %v2456_v13 = vmax.f32 %v2454_v5, 0.0 }
 0x878   :  { %v2461_v14 = vrot.slane %v2457_v16, 1  ;;  %v2468_v62 = vrot.slane %v2457_v16, 2 }
 0x879   :  { %v2460_v27 = vrot.slane %v2456_v13, 1  ;;  %v2467_v15 = vrot.slane %v2456_v13, 2 }
 0x87a   :  { %v2466_v56 = vmax.f32 %v2457_v16, %v2461_v14 }
 0x87b   :  { %v2462_v59 = vsel %vm734_vm1, %v2460_v27, %v2461_v14  ;;  %v2469_v9 = vsel %vm742_vm2, %v2467_v15, %v2468_v62  ;;  %vm3625_vm1 = vcmask 254976  }
 0x87c   :  { %v2465_v22 = vmax.f32 %v2456_v13, %v2462_v59  ;;  %v2473_v21 = vmax.f32 %v2466_v56, %v2468_v62 }
 0x87e   :  { %v2472_v10 = vmax.f32 %v2465_v22, %v2469_v9 }
 0x880   :  { %v5537_v58 = vpack.i.bf16 %v2473_v21, %v2472_v10 }
 0x882   :  { %5538 = vrot.lane.b32.xlu1 %v5537_v58, %s5705_s28  ;;  %5533 = vrot.lane.b32.xlu0 %v5537_v58, %s5704_s26 }
 0x8f4   :  { %v5539_v24 = vpop.permute.xlu1 %5538  ;;  %v5534_v31 = vpop.permute.xlu0 %5533 }
 0x8f5   :  { %v5536_v35 = vunpack.i.h.bf16 %v5534_v31  ;;  %v5535_v40 = vunpack.i.l.bf16 %v5534_v31  ;;  %v5541_v45 = vunpack.i.h.bf16 %v5539_v24  ;;  %v5540_v49 = vunpack.i.l.bf16 %v5539_v24  ;;  %v7215_v31 = vld [vmem:[#allocation22_spill] sm:$0xff] }
 0x8f7   :  { %v2483_v52 = vmax.f32 %v2473_v21, %v5536_v35  ;;  %v2482_v55 = vmax.f32 %v2472_v10, %v5535_v40  ;;  %v7216_v35 = vld [vmem:[#allocation23_spill] sm:$0xff]  ;;  %v7217_v40 = vld [vmem:[#allocation24_spill] sm:$0xff] }
 0x8f9   :  { %v2491_v5 = vmax.f32 %v2483_v52, %v5541_v45  ;;  %v2490_v16 = vmax.f32 %v2482_v55, %v5540_v49  ;;  %v7218_v45 = vld [vmem:[#allocation25_spill] sm:$0xff]  ;;  %v7219_v49 = vld [vmem:[#allocation26_spill] sm:$0xff]  ;;  %v7220_v52 = vld [vmem:[#allocation27_spill] sm:$0xff] }
 0x8fb   :  { %v5267_v14 = vpack.c.bf16 %v2491_v5, %v2490_v16 }
 0x8fd   :  { %5269 = vmatpush3.bf16.msk.msra.mxu0 %vm6050_vm5, %v5267_v14 }
 0x8fe   :  { %5270 = vmatprep.subr.bf16.mxu0 %v7185_v30 }
 0x900   :  { %4679 = vmatmul.mubr.msk.f32.vlgmr.msra.gmra.mrb[22].mxu0 %vm773_vm6, %v6065_v33 }
 0x901   :  { %4681 = vmatprep.mubr.msk.f32.mxu0 %vm5702_vm3, %v7187_v37  ;;  %5272 = vmatpush3.bf16.msra.mxu0 %v6067_v34 }
 0x902   :  { %5273 = vmatprep.subr.bf16.mxu0 %v7185_v30 }
 0x904   :  { %4682 = vmatmul.mubr.msk.f32.gmra.mrb[24].mxu0 %vm773_vm6, %v6083_v38 }
 0x905   :  { %4684 = vmatprep.mubr.msk.f32.mxu0 %vm5702_vm3, %v7187_v37  ;;  %5275 = vmatpush3.bf16.msra.mxu0 %v6086_v39 }
 0x906   :  { %5276 = vmatprep.subr.bf16.mxu0 %v7185_v30 }
 0x908   :  { %4685 = vmatmul.mubr.msk.f32.gmra.mrb[26].mxu0 %vm773_vm6, %v6102_v43 }
 0x909   :  { %4687 = vmatprep.mubr.msk.f32.mxu0 %vm5702_vm3, %v7187_v37  ;;  %5278 = vmatpush3.bf16.msra.mxu0 %v6105_v44 }
 0x90a   :  { %5279 = vmatprep.subr.bf16.mxu0 %v7185_v30 }
 0x90c   :  { %4688 = vmatmul.mubr.msk.f32.gmra.mrb[28].mxu0 %vm773_vm6, %v6121_v48 }
 0x90d   :  { %4690 = vmatprep.mubr.msk.f32.mxu0 %vm5702_vm3, %v7187_v37  ;;  %5281 = vmatpush3.bf16.msra.mxu0 %v6124_v50 }
 0x90e   :  { %5282 = vmatprep.subr.bf16.mxu0 %v7185_v30 }
 0x910   :  { %4691 = vmatmul.mubr.msk.f32.gmra.mrb[30].mxu0 %vm773_vm6, %v6140_v54 }
 0x911   :  { %5284 = vmatpush3.bf16.msra.mxu0 %v6143_v57  ;;  %4721 = vmatprep.mubr.msk.f32.mxu0 %vm5702_vm3, %v7187_v37 }
 0x912   :  { %5285 = vmatprep.subr.bf16.mxu0 %v7185_v30 }
 0x915   :  { %5287 = vmatpush3.bf16.msra.mxu0 %v6155_v61 }
 0x916   :  { %5288 = vmatprep.subr.bf16.mxu0 %v7185_v30 }
 0x919   :  { %5290 = vmatpush3.bf16.msra.mxu0 %v6168_v0 }
 0x91a   :  { %5291 = vmatprep.subr.bf16.mxu0 %v7185_v30 }
 0x9d3   :  { %v2561_v28 = vpop.f32.mrb[22].mxu0 }
 0x9d4   :  { %v4680_v33 = vpop.f32.mrb[23].mxu0  ;;  %v2587_v38 = vrot.slane %v2561_v28, 7 }
 0x9d7   :  { %v2566_v34 = vpop.f32.mrb[24].mxu0 }
 0x9d8   :  { %v2588_v39 = vrot.slane %v2566_v34, 7  ;;  %v4683_v43 = vpop.f32.mrb[25].mxu0  ;;  %v2735_v50 = vrot.slane %v2566_v34, 6  ;;  %v7221_v34 = vld [vmem:[#allocation28_spill] sm:$0xff] }
 0x9d9   :  { %v7224_v43 = vld [vmem:[#allocation31_spill] sm:$0xff] }
 0x9da   :  { %v2589_v44 = vsel %vm913_vm7, %v2587_v38, %v2588_v39  ;;  %v7222_v38 = vld [vmem:[#allocation29_spill] sm:$0xff]  ;;  %v7223_v39 = vld [vmem:[#allocation30_spill] sm:$0xff] }
 0x9db   :  { %4722 = vmatmul.mubr.msk.f32.vlgmr.msra.gmra.mrb[32].mxu0 %vm917_vm8, %v2589_v44  ;;  %v2571_v48 = vpop.f32.mrb[26].mxu0  ;;  %v7225_v44 = vld [vmem:[#allocation32_spill] sm:$0xff] }
 0x9dc   :  { %5293 = vmatpush3.bf16.msra.mxu0 %v6181_v8  ;;  %v2736_v54 = vrot.slane %v2571_v48, 6  ;;  %4752 = vmatprep.mubr.msk.f32.mxu0 %vm5702_vm3, %v7187_v37  ;;  %v4686_v57 = vpop.f32.mrb[27].mxu0  ;;  %v2812_v61 = vrot.slane %v2571_v48, 5  ;;  %v7226_v48 = vld [vmem:[#allocation33_spill] sm:$0xff] }
 0x9dd   :  { %5294 = vmatprep.subr.bf16.mxu0 %v7185_v30  ;;  %v7229_v57 = vld [vmem:[#allocation36_spill] sm:$0xff] }
 0x9de   :  { %v2737_v0 = vsel %vm1078_vm9, %v2735_v50, %v2736_v54  ;;  %v7227_v50 = vld [vmem:[#allocation34_spill] sm:$0xff]  ;;  %v7228_v54 = vld [vmem:[#allocation35_spill] sm:$0xff] }
 0x9df   :  { %v2576_v13 = vpop.f32.mrb[28].mxu0 }
 0x9e0   :  { %5296 = vmatpush3.bf16.msra.mxu0 %v6192_v18  ;;  %v2813_v62 = vrot.slane %v2576_v13, 5  ;;  %v4689_v27 = vpop.f32.mrb[29].mxu0  ;;  %v2889_v15 = vrot.slane %v2576_v13, 4  ;;  %v7209_v18 = vld [vmem:[#allocation16_spill] sm:$0xff]  ;;  %v7232_v13 = vld [vmem:[#allocation39_spill] sm:$0xff] }
 0x9e1   :  { %5297 = vmatprep.subr.bf16.mxu0 %v7185_v30  ;;  %v7234_v27 = vld [vmem:[#allocation41_spill] sm:$0xff] }
 0x9e2   :  { %v2814_v8 = vsel %vm1171_vm10, %v2812_v61, %v2813_v62  ;;  %v7230_v61 = vld [vmem:[#allocation37_spill] sm:$0xff]  ;;  %v7233_v62 = vld [vmem:[#allocation40_spill] sm:$0xff] }
 0x9e3   :  { %v2581_v56 = vpop.f32.mrb[30].mxu0 }
 0x9e4   :  { %5299 = vmatpush3.bf16.msra.mxu0 %v6207_v29  ;;  %v2890_v59 = vrot.slane %v2581_v56, 4  ;;  %v4692_v9 = vpop.f32.mrb[31].mxu0  ;;  %v7210_v29 = vld [vmem:[#allocation17_spill] sm:$0xff]  ;;  %v7236_v56 = vld [vmem:[#allocation43_spill] sm:$0xff] }
 0x9e5   :  { %5300 = vmatprep.subr.bf16.mxu0 %v7185_v30  ;;  %v7238_v9 = vld [vmem:[#allocation45_spill] sm:$0xff] }
 0x9e6   :  { %v2891_v22 = vsel %vm1264_vm11, %v2889_v15, %v2890_v59  ;;  %v7235_v15 = vld [vmem:[#allocation42_spill] sm:$0xff]  ;;  %v7237_v59 = vld [vmem:[#allocation44_spill] sm:$0xff] }
 0x9e8   :  { %5302 = vmatpush3.bf16.msra.mxu0 %v6220_v47  ;;  %v7211_v47 = vld [vmem:[#allocation18_spill] sm:$0xff] }
 0x9e9   :  { %5303 = vmatprep.subr.bf16.mxu0 %v7185_v30 }
 0x9ec   :  { %5305 = vmatpush3.bf16.msra.mxu0 %v6233_v63  ;;  %v7212_v63 = vld [vmem:[#allocation19_spill] sm:$0xff] }
 0x9ed   :  { %5306 = vmatprep.subr.bf16.mxu0 %v7185_v30 }
 0x9f0   :  { %5308 = vmatpush3.bf16.msra.mxu0 %v6243_v4  ;;  %v6992_v4 = vld [vmem:[#allocation5] ss:$0 sm:$0xff] }
 0x9f1   :  { %5309 = vmatprep.subr.bf16.mxu0 %v7185_v30 }
 0x9f4   :  { %5311 = vmatpush3.bf16.msra.mxu0 %v6253_v7  ;;  %v1895_v7 = vmul.f32 %v6992_v4, %v6839_v20 }
 0x9f5   :  { %5312 = vmatprep.subr.bf16.mxu0 %v7185_v30 }
 0x9f7   :  { %4753 = vmatmul.mubr.msk.f32.vlgmr.msra.gmra.mrb[32].mxu0 %vm917_vm8, %v2561_v28 }
 0x9f8   :  { %5314 = vmatpush3.bf16.msra.mxu0 %v6263_v12  ;;  %4783 = vmatprep.mubr.msk.f32.mxu0 %vm5702_vm3, %v7187_v37  ;;  %v6999_v12 = vld [vmem:[%s7129_s12] ss:$0 sm:$0xff] }
 0x9f9   :  { %5315 = vmatprep.subr.bf16.mxu0 %v7185_v30 }
 0x9fc   :  { %5317 = vmatpush3.bf16.msra.mxu0 %v6275_v17  ;;  %v1903_v17 = vadd.f32 %v6999_v12, %v1895_v7  ;;  %v3456_v7 = vld [vmem:[#allocation7] sm:$0xff] }
 0x9fd   :  { %5318 = vmatprep.subr.bf16.mxu0 %v7185_v30 }
 0xa00   :  { %5320 = vmatpush3.bf16.msra.mxu0 %v6287_v1 }
 0xa01   :  { %5321 = vmatprep.subr.bf16.mxu0 %v7185_v30 }
 0xa04   :  { %5323 = vmatpush3.bf16.msra.mxu0 %v6297_v25  ;;  %v7213_v25 = vld [vmem:[#allocation20_spill] sm:$0xff] }
 0xa05   :  { %5324 = vmatprep.subr.bf16.mxu0 %v7185_v30 }
 0xa08   :  { %5326 = vmatpush3.bf16.msra.mxu0 %v6307_v32 }
 0xa09   :  { %5327 = vmatprep.subr.bf16.mxu0 %v7185_v30 }
 0xa0c   :  { %5329 = vmatpush3.bf16.msra.mxu0 %v6317_v41 }
 0xa0d   :  { %5330 = vmatprep.subr.bf16.mxu0 %v7185_v30 }
 0xa10   :  { %5332 = vmatpush3.bf16.msra.mxu0 %v6327_v53  ;;  %v1904_v53 = vmax.f32 %v1903_v17, 0.0 }
 0xa11   :  { %5333 = vmatprep.subr.bf16.mxu0 %v7185_v30 }
 0xa13   :  { %4784 = vmatmul.mubr.msk.f32.vlgmr.msra.gmra.mrb[32].mxu0 %vm917_vm8, %v2737_v0  ;;  %v7231_v0 = vld [vmem:[#allocation38_spill] sm:$0xff] }
 0xa14   :  { %5335 = vmatpush3.bf16.msra.mxu0 %v6337_v2  ;;  %4814 = vmatprep.mubr.msk.f32.mxu0 %vm5702_vm3, %v7187_v37  ;;  %v7214_v2 = vld [vmem:[#allocation21_spill] sm:$0xff] }
 0xa15   :  { %5336 = vmatprep.subr.bf16.mxu0 %v7185_v30 }
 0xa18   :  { %5338 = vmatpush3.bf16.msra.mxu0 %v6349_v6 }
 0xa19   :  { %5339 = vmatprep.subr.bf16.mxu0 %v7185_v30 }
 0xa1c   :  { %5341 = vmatpush3.bf16.msra.mxu0 %v6361_v26 }
 0xa1d   :  { %5342 = vmatprep.subr.bf16.mxu0 %v7185_v30 }
 0xa20   :  { %5344 = vmatpush3.bf16.msra.mxu0 %v6371_v19  ;;  %v1906_v19 = vrot.slane %v1904_v53, 1 }
 0xa21   :  { %5345 = vmatprep.subr.bf16.mxu0 %v7185_v30 }
 0xa24   :  { %5347 = vmatpush3.bf16.msra.mxu0 %v6381_v23 }
 0xa25   :  { %5348 = vmatprep.subr.bf16.mxu0 %v7185_v30 }
 0xa28   :  { %5350 = vmatpush3.bf16.msra.mxu0 %v6391_v36 }
 0xa29   :  { %5351 = vmatprep.subr.bf16.mxu0 %v7185_v30 }
 0xa2c   :  { %5353 = vmatpush3.bf16.msra.mxu0 %v6401_v51 }
 0xa2d   :  { %5354 = vmatprep.subr.bf16.mxu0 %v7185_v30 }
 0xa2f   :  { %4815 = vmatmul.mubr.msk.f32.vlgmr.msra.gmra.mrb[32].mxu0 %vm917_vm8, %v2814_v8 }
 0xa30   :  { %5356 = vmatpush3.bf16.msra.mxu0 %v6411_v3  ;;  %4845 = vmatprep.mubr.msk.f32.mxu0 %vm5702_vm3, %v7187_v37 }
 0xa31   :  { %5357 = vmatprep.subr.bf16.mxu0 %v7185_v30 }
 0xa34   :  { %5359 = vmatpush3.bf16.msra.mxu0 %v6423_v11  ;;  %v1908_v11 = vmax.f32 %v1904_v53, %v1906_v19 }
 0xa35   :  { %5360 = vmatprep.subr.bf16.mxu0 %v7185_v30 }
 0xa38   :  { %5362 = vmatpush3.bf16.msra.mxu0 %v6435_v42  ;;  %v1909_v42 = vrot.slane %v1904_v53, 2 }
 0xa39   :  { %5363 = vmatprep.subr.bf16.mxu0 %v7185_v30 }
 0xa3a   :  { %v7006_v20 = vmax.f32 %v1908_v11, %v1909_v42  ;;  %v3543_v42 = vld [vmem:[%s7132_s15 + $0x18] sm:$0xff] }
 0xa3c   :  { %5365 = vmatpush3.bf16.msra.mxu0 %v7209_v18 }
 0xa3d   :  { %5366 = vmatprep.subr.bf16.mxu0 %v7185_v30 }
 0xa40   :  { %5368 = vmatpush3.bf16.msra.mxu0 %v7210_v29 }
 0xa41   :  { %5369 = vmatprep.subr.bf16.mxu0 %v7185_v30 }
 0xa44   :  { %5371 = vmatpush3.bf16.msra.mxu0 %v7211_v47 }
 0xa45   :  { %5372 = vmatprep.subr.bf16.mxu0 %v7185_v30 }
 0xa48   :  { %5374 = vmatpush3.bf16.msra.mxu0 %v7212_v63 }
 0xa49   :  { %5453 = vmatprep.subr.bf16.mxu0 %v7185_v30 }
 0xa4b   :  { %4846 = vmatmul.mubr.msk.f32.vlgmr.msra.gmra.mrb[32].mxu0 %vm917_vm8, %v2891_v22 }
 0xa4c   :  { %4983 = vmatprep.mubr.msk.f32.mxu0 %vm5702_vm3, %v7187_v37 }
 0xb1e   :  { %v2960_v1 = vpop.f32.mrb[32].mxu0 }
 0xb1f   :  { %v2965_v32 = vmul.f32 %v7213_v25, %v2960_v1  ;;  %v4847_v41 = vpop.f32.mrb[33].mxu0 }
 0xb20   :  { %v3540_v41 = vld [vmem:[%s7132_s15] sm:$0xff] }
 0xb21   :  { %v2966_v6 = vadd.f32 %v7214_v2, %v2965_v32 }
 0xb23   :  { %v2967_v26 = vmax.f32 %v2966_v6, 0.0 }
 0xb25   :  { %v2969_v23 = vrot.slane %v2967_v26, 1  ;;  %v2972_v51 = vrot.slane %v2967_v26, 2 }
 0xb27   :  { %v2971_v36 = vmax.f32 %v2967_v26, %v2969_v23 }
 0xb29   :  { %v2974_v3 = vmax.f32 %v2971_v36, %v2972_v51 }
 0xb2b   :  { %2980 = vrot.lane.b32.xlu1 %v2974_v3, %s5707_s8  ;;  %2976 = vrot.lane.b32.xlu0 %v2974_v3, %s5705_s28 }
 0xb2f   :  { %1913 = vrot.lane.b32.xlu1 %v7006_v20, %s5705_s28 }
 0xb33   :  { %1917 = vrot.lane.b32.xlu1 %v7006_v20, %s5707_s8 }
 0xb9d   :  { %v2977_v10 = vpop.permute.xlu0 %2976  ;;  %v2981_v58 = vpop.permute.xlu1 %2980 }
 0xb9e   :  { %v2979_v21 = vmax.f32 %v2974_v3, %v2977_v10 }
 0xba0   :  { %v2983_v24 = vmax.f32 %v2979_v21, %v2981_v58  ;;  %v3844_v21 = vld [vmem:[#allocation8] ss:$0 sm:$0xff] }
 0xba2   :  { %4848 = vmatprep.subr.msk.mxu1 %vm1383_vm13, %v2983_v24 }
 0xba3   :  { %4849 = vmatpush3.msk.msra.mxu1 %vm1383_vm13, %v2983_v24 }
 0xba4   :  { %4851 = vmatmul.mubr.msk.f32.vlgmr.msra.gmra.mrb[18].mxu1 %vm1376_vm12, %v7215_v31  ;;  %5375 = vmatprep.subr.bf16.mxu1 %v7185_v30 }
 0xba5   :  { %5377 = vmatpush3.bf16.msra.mxu1 %v7216_v35  ;;  %4873 = vmatprep.mubr.msk.f32.mxu1 %vm5702_vm3, %v7187_v37  ;;  %v3846_v35 = vld [vmem:[#allocation10] ss:$0 sm:$0xff] }
 0xba6   :  { %5378 = vmatprep.subr.bf16.mxu1 %v7185_v30 }
 0xba9   :  { %5380 = vmatpush3.bf16.msra.mxu1 %v7217_v40 }
 0xbaa   :  { %5381 = vmatprep.subr.bf16.mxu1 %v7185_v30 }
 0xbad   :  { %5383 = vmatpush3.bf16.msra.mxu1 %v7218_v45 }
 0xbae   :  { %5384 = vmatprep.subr.bf16.mxu1 %v7185_v30 }
 0xbb1   :  { %5386 = vmatpush3.bf16.msra.mxu1 %v7219_v49 }
 0xbb2   :  { %5387 = vmatprep.subr.bf16.mxu1 %v7185_v30 }
 0xbb5   :  { %5389 = vmatpush3.bf16.msra.mxu1 %v7220_v52 }
 0xbb6   :  { %5390 = vmatprep.subr.bf16.mxu1 %v7185_v30 }
 0xc77   :  { %v4852_v55 = vpop.f32.mrb[18].mxu1 }
 0xc78   :  { %v3210_v5 = vrot.slane %v4852_v55, 6  ;;  %v3053_v16 = vpop.f32.mrb[19].mxu1  ;;  %v3285_v8 = vrot.slane %v4852_v55, 1  ;;  %v3359_v22 = vrot.slane %v4852_v55, 4 }
 0xc79   :  { %v3063_v14 = vrot.slane %v3053_v16, 3  ;;  %v3209_v28 = vrot.slane %v3053_v16, 6 }
 0xc7b   :  { %4874 = vmatmul.mubr.msk.f32.vlgmr.msra.gmra.mrb[20].mxu1 %vm1485_vm14, %v3063_v14  ;;  %v3211_v33 = vsel %vm1078_vm9, %v3209_v28, %v3210_v5 }
 0xc7c   :  { %5392 = vmatpush3.bf16.msra.mxu1 %v7221_v34  ;;  %4896 = vmatprep.mubr.msk.f32.mxu1 %vm5702_vm3, %v7187_v37 }
 0xc7d   :  { %5393 = vmatprep.subr.bf16.mxu1 %v7185_v30 }
 0xc80   :  { %5395 = vmatpush3.bf16.msra.mxu1 %v7222_v38 }
 0xc81   :  { %5396 = vmatprep.subr.bf16.mxu1 %v7185_v30 }
 0xc84   :  { %5398 = vmatpush3.bf16.msra.mxu1 %v7223_v39 }
 0xc85   :  { %5399 = vmatprep.subr.bf16.mxu1 %v7185_v30 }
 0xc88   :  { %5401 = vmatpush3.bf16.msra.mxu1 %v7224_v43 }
 0xc89   :  { %5402 = vmatprep.subr.bf16.mxu1 %v7185_v30 }
 0xc8c   :  { %5404 = vmatpush3.bf16.msra.mxu1 %v7225_v44 }
 0xc8d   :  { %5405 = vmatprep.subr.bf16.mxu1 %v7185_v30 }
 0xc8f   :  { %4897 = vmatmul.mubr.msk.f32.vlgmr.msra.gmra.mrb[20].mxu1 %vm1485_vm14, %v3053_v16 }
 0xc90   :  { %5407 = vmatpush3.bf16.msra.mxu1 %v7226_v48  ;;  %4919 = vmatprep.mubr.msk.f32.mxu1 %vm5702_vm3, %v7187_v37 }
 0xc91   :  { %5408 = vmatprep.subr.bf16.mxu1 %v7185_v30 }
 0xc94   :  { %5410 = vmatpush3.bf16.msra.mxu1 %v7227_v50 }
 0xc95   :  { %5411 = vmatprep.subr.bf16.mxu1 %v7185_v30 }
 0xc98   :  { %5413 = vmatpush3.bf16.msra.mxu1 %v7228_v54 }
 0xc99   :  { %5414 = vmatprep.subr.bf16.mxu1 %v7185_v30 }
 0xc9c   :  { %5416 = vmatpush3.bf16.msra.mxu1 %v7229_v57 }
 0xc9d   :  { %5417 = vmatprep.subr.bf16.mxu1 %v7185_v30 }
 0xca0   :  { %5419 = vmatpush3.bf16.msra.mxu1 %v7230_v61 }
 0xca1   :  { %5420 = vmatprep.subr.bf16.mxu1 %v7185_v30 }
 0xca3   :  { %4920 = vmatmul.mubr.msk.f32.vlgmr.msra.gmra.mrb[20].mxu1 %vm1485_vm14, %v3211_v33 }
 0xca4   :  { %5422 = vmatpush3.bf16.msra.mxu1 %v7231_v0  ;;  %4942 = vmatprep.mubr.msk.f32.mxu1 %vm5702_vm3, %v7187_v37 }
 0xca5   :  { %5423 = vmatprep.subr.bf16.mxu1 %v7185_v30 }
 0xca8   :  { %5425 = vmatpush3.bf16.msra.mxu1 %v7232_v13 }
 0xca9   :  { %5426 = vmatprep.subr.bf16.mxu1 %v7185_v30 }
 0xcac   :  { %5428 = vmatpush3.bf16.msra.mxu1 %v7233_v62 }
 0xcad   :  { %5429 = vmatprep.subr.bf16.mxu1 %v7185_v30 }
 0xcb0   :  { %5431 = vmatpush3.bf16.msra.mxu1 %v7234_v27 }
 0xcb1   :  { %5432 = vmatprep.subr.bf16.mxu1 %v7185_v30 }
 0xcb4   :  { %5434 = vmatpush3.bf16.msra.mxu1 %v7235_v15 }
 0xcb5   :  { %5435 = vmatprep.subr.bf16.mxu1 %v7185_v30 }
 0xcb7   :  { %4943 = vmatmul.mubr.msk.f32.vlgmr.msra.gmra.mrb[20].mxu1 %vm1485_vm14, %v3285_v8 }
 0xcb8   :  { %5437 = vmatpush3.bf16.msra.mxu1 %v7236_v56  ;;  %4965 = vmatprep.mubr.msk.f32.mxu1 %vm5702_vm3, %v7187_v37 }
 0xcb9   :  { %5438 = vmatprep.subr.bf16.mxu1 %v7185_v30 }
 0xcbc   :  { %5440 = vmatpush3.bf16.msra.mxu1 %v7237_v59 }
 0xcbd   :  { %5441 = vmatprep.subr.bf16.mxu1 %v7185_v30 }
 0xcc0   :  { %5443 = vmatpush3.bf16.msra.mxu1 %v7238_v9 }
 0xcc1   :  { %5444 = vmatprep.subr.bf16.mxu1 %v7185_v30 }
 0xcc4   :  { %5446 = vmatpush3.bf16.msra.mxu1 %v6766_v46  ;;  %v3457_v46 = vld [vmem:[#allocation7 + $0x8] sm:$0xff] }
 0xcc5   :  { %5447 = vmatprep.subr.bf16.mxu1 %v7185_v30  ;;  %v5451_v17 = vpack.c.bf16 %v3457_v46, %v3456_v7 }
 0xcc8   :  { %5449 = vmatpush3.bf16.msra.mxu1 %v6782_v60 }
 0xcc9   :  { %5450 = vmatprep.subr.bf16.mxu1 %v7185_v30 }
 0xccb   :  { %4966 = vmatmul.mubr.msk.f32.vlgmr.msra.gmra.mrb[20].mxu1 %vm1485_vm14, %v3359_v22 }
 0xccc   :  { %4972 = vmatprep.mubr.msk.f32.mxu1 %vm5702_vm3, %v7187_v37  ;;  %5452 = vmatpush3.bf16.msra.mxu1 %v5451_v17  ;;  %v3541_v37 = vld [vmem:[%s7132_s15 + $0x8] sm:$0xff] }
 0xd9e   :  { %v3428_v18 = vpop.f32.mrb[20].mxu1 }
 0xd9f   :  { %v3433_v29 = vmul.f32 %v6992_v4, %v3428_v18  ;;  %v4967_v47 = vpop.f32.mrb[21].mxu1  ;;  %v5454_v4 = vpack.c.bf16 %v3541_v37, %v3540_v41 }
 0xda1   :  { %v3434_v63 = vadd.f32 %v6999_v12, %v3433_v29  ;;  %5455 = vmatpush3.bf16.msra.mxu0 %v5454_v4  ;;  %v1914_v12 = vpop.permute.xlu1 %1913 }
 0xda2   :  { %5456 = vmatprep.subr.bf16.mxu0 %v7185_v30  ;;  %v1916_v23 = vmax.f32 %v7006_v20, %v1914_v12  ;;  %v3542_v30 = vld [vmem:[%s7132_s15 + $0x10] sm:$0xff]  ;;  %s5664_s15 = scalar_lea.vmem %s3634_s16, 32 }
 0xda3   :  { %v3435_v1 = vmax.f32 %v3434_v63, 0.0  ;;  %v5457_v10 = vpack.c.bf16 %v3543_v42, %v3542_v30  ;;  %p5665_p12 = scmp.ne.s32.totalorder %s3634_s16, %s5664_s15  ;;  %p5670_p0 = scmp.lt.s32.totalorder %s5664_s15, %s5664_s15 }
 0xda5   :  { %v3437_v60 = vrot.slane %v3435_v1, 1  ;;  %v3440_v32 = vrot.slane %v3435_v1, 2  ;;  %v1918_v26 = vpop.permute.xlu1 %1917  ;;  %5458 = vmatpush3.bf16.msra.mxu0 %v5457_v10  ;;  %p5671_p1 = por %p5670_p0, %p5669_p13 }
 0xda6   :  { %v1920_v51 = vmax.f32 %v1916_v23, %v1918_v26 }
 0xda7   :  { %v3439_v25 = vmax.f32 %v3435_v1, %v3437_v60  ;;  %p5672_p2 = pnand %p5671_p1, %p5665_p12 }
 0xda9   :  { %v3442_v53 = vmax.f32 %v3439_v25, %v3440_v32 }
 0xdab   :  { %3444 = vrot.lane.b32.xlu0 %v3442_v53, %s5705_s28 }
 0xdaf   :  { %3448 = vrot.lane.b32.xlu0 %v3442_v53, %s5707_s8 }
 0xe1d   :  { %v3445_v2 = vpop.permute.xlu0 %3444 }
 0xe1e   :  { %v3447_v6 = vmax.f32 %v3442_v53, %v3445_v2 }
 0xe21   :  { %v3449_v19 = vpop.permute.xlu0 %3448 }
 0xe22   :  { %v3451_v36 = vmax.f32 %v3447_v6, %v3449_v19 }
 0xe24   :  { %v3453_v3 = vrot.slane %v3451_v36, 7 }
 0xe26   :  { %v3455_v11 = vsel %vm913_vm7, %v1920_v51, %v3453_v3 }
 0xe27   :  { %4973 = vmatmul.mubr.msk.f32.vlgmr.msra.gmra.mrb[22].mxu1 %vm3465_vm15, %v3455_v11 }
 0xefa   :  { %v3535_v58 = vpop.f32.mrb[22].mxu1 }
 0xefb   :  { %v3536_v20 = vadd.f32 %v3844_v21, %v3535_v58  ;;  %v4974_v24 = vpop.f32.mrb[23].mxu1 }
 0xefd   :  { %v3539_v31 = vmax.f32 %v3536_v20, 0.0 }
 0xeff   :  { %4984 = vmatmul.mubr.msk.f32.vlgmr.msra.gmra.mrb[34].mxu0 %vm131_vm0, %v3539_v31 }
 0xfd2   :  { %v3620_v40 = vpop.f32.mrb[34].mxu0 }
 0xfd3   :  { %v3621_v45 = vadd.f32 %v3846_v35, %v3620_v40  ;;  %v4985_v49 = vpop.f32.mrb[35].mxu0 }
 0xfd5   :  { %v3624_v52 = vmax.f32 %v3621_v45, 0.0 }
 0xfd7   :  { %3626 = vst.msk [vmem:[#allocation11] sm:$0x3] %vm3625_vm1, %v3624_v52 }
 0xfd8   :  { %5675 = shalt.err (!%p5672_p2)
}
 0xfd9   :  { %s5676_s27 = scalar_lea.hbm %s7134_s17, 32 }
 0xfda   :  { %p5677_p3 = scmp.ne.s32.totalorder %s7134_s17, %s5676_s27  ;;  %p5680_p4 = scmp.lt.u32.totalorder %s5676_s27, %s7134_s17 }
 0xfdc   :  { %p5682_p5 = pnand %p5680_p4, %p5677_p3 }
 0xfde   :  { %5685 = shalt.err (!%p5682_p5)
}
 0xfdf   :  { %3636 = dma.vmem_to_hbm [thread:$0]  %s3634_s16, 32, %s7134_s17, [#allocation4]  }
 0xfe0   :  { %5692 = dma.done.wait [#allocation4], 32  }
 0xfe1   :  { %5693 = vsyncadd [#allocation4], 4294967264 }
 0xfe2   :  { %3640 = vsyncpa [#allocation3], 1 }
 0xfe3   :  { %3641 = vsyncpa [#allocation6], 1 }
 0xfe4   :  { %3642 = vsyncpa [#allocation9], 1 }
 0xfe5   :  { %3643 = vsyncpa [#allocation4], 1 }

</bundles_post_ra>
